<compile_context>
chip_gen: v7x
topology: tpu7x:2x2x1
jax: 0.10.0
libtpu: 0.0.40
codegen_flags: <defaults>
</compile_context>

<pallas_src>
import math
import functools

import jax
import jax.numpy as jnp
from jax.experimental import pallas as pl
from jax.experimental.pallas import tpu as pltpu


# --------------------------------------------------------------------------------------
# Kernels
# --------------------------------------------------------------------------------------
def _cheb_kernel(x_ref, adj_ref, w_ref, b_ref, out_ref,
                 acc_ref, tprev_c_ref, tprev_f_ref, tpp_f_ref, tcur_f_ref,
                 *, tm, tk, nsteps):
    """Fused Chebyshev graph convolution for K >= 2.

    Grid: (nsteps = K-1, row tiles, adj reduction tiles).
      x_ref    : [Np, Fin_p]   compute dtype (resident)
      adj_ref  : [TM, TK]      compute dtype (streamed tile)
      w_ref    : [K, Fin_p, Fout_p] compute dtype (resident)
      b_ref    : [1, Fout_p]   f32 (resident)
      out_ref  : [Np, Fout_p]  f32 (resident accumulator)
    Scratch:
      acc_ref    : [TM, Fin_p] f32   -- adj-tile @ T_{s-1} accumulator
      tprev_c_ref: [Np, Fin_p] cdt   -- T_{s-1} in compute dtype (matmul operand)
      tprev_f_ref: [Np, Fin_p] f32   -- T_{s-1} in f32
      tpp_f_ref  : [Np, Fin_p] f32   -- T_{s-2} in f32
      tcur_f_ref : [Np, Fin_p] f32   -- T_s being built
    """
    sg = pl.program_id(0)          # Chebyshev step s = sg + 1
    i = pl.program_id(1)           # output row tile
    kr = pl.program_id(2)          # reduction tile over adj columns
    ni = pl.num_programs(1)
    nk = pl.num_programs(2)

    rows = pl.ds(pl.multiple_of(i * tm, tm), tm)
    cols = pl.ds(pl.multiple_of(kr * tk, tk), tk)

    # ---- one-time priming of the recurrence state: T_0 = x ----------------------------
    @pl.when((sg == 0) & (i == 0) & (kr == 0))
    def _():
        x_all = x_ref[...]
        tprev_c_ref[...] = x_all
        tprev_f_ref[...] = x_all.astype(jnp.float32)

    # ---- first visit of this row tile: out = x @ W_0 + bias ---------------------------
    @pl.when((sg == 0) & (kr == 0))
    def _():
        out_ref[rows, :] = (
            jnp.dot(x_ref[rows, :], w_ref[0], preferred_element_type=jnp.float32)
            + b_ref[...]
        )

    # ---- reduction over adj column tiles: acc += adj[i, k] @ T_{s-1}[k, :] -------------
    @pl.when(kr == 0)
    def _():
        acc_ref[...] = jnp.zeros_like(acc_ref)

    acc_ref[...] += jnp.dot(adj_ref[...], tprev_c_ref[cols, :],
                            preferred_element_type=jnp.float32)

    # ---- end of the reduction for this row tile ----------------------------------------
    @pl.when(kr == nk - 1)
    def _():
        def finish(t_new):
            # store T_s rows (for the next step) and add its output contribution
            tcur_f_ref[rows, :] = t_new
            out_ref[rows, :] += jnp.dot(
                t_new.astype(tprev_c_ref.dtype), w_ref[sg + 1],
                preferred_element_type=jnp.float32)

        @pl.when(sg == 0)
        def _():
            finish(acc_ref[...])                               # T_1 = adj @ T_0

        @pl.when(sg > 0)
        def _():
            finish(2.0 * acc_ref[...] - tpp_f_ref[rows, :])    # T_s = 2 adj T_{s-1} - T_{s-2}

    # ---- end of the Chebyshev step: roll the recurrence state --------------------------
    @pl.when((kr == nk - 1) & (i == ni - 1) & (sg + 1 < nsteps))
    def _():
        tpp_f_ref[...] = tprev_f_ref[...]
        t_next = tcur_f_ref[...]
        tprev_f_ref[...] = t_next
        tprev_c_ref[...] = t_next.astype(tprev_c_ref.dtype)


def _linear_bias_kernel(x_ref, w_ref, b_ref, out_ref):
    """K == 1 fallback: out = x @ W_0 + bias (row-tiled, megacore-parallel)."""
    out_ref[...] = (
        jnp.dot(x_ref[...], w_ref[0], preferred_element_type=jnp.float32)
        + b_ref[...]
    )


# --------------------------------------------------------------------------------------
# Wrapper
# --------------------------------------------------------------------------------------
def _round_up(v, m):
    return ((v + m - 1) // m) * m


def _pick_tile(n_pad, target):
    """Largest multiple of 128 <= target that divides n_pad (n_pad is a multiple of 128)."""
    t = max(128, min(target, n_pad))
    while n_pad % t != 0:
        t -= 128
    return t


def cheb_convolution(x, adj, weights, bias=None, *, k=None,
                     compute_dtype=jnp.bfloat16,
                     block_rows=256, block_red=512,
                     single_param=False):
    """Chebyshev graph convolution forward.

    x:       [N, F_in]            float32
    adj:     [N, N]               float32 (dense normalized adjacency)
    weights: [K, F_in, F_out]     float32 (already transposed: y = x @ W)
    bias:    [F_out] or None
    compute_dtype: matmul operand dtype (bf16 for MXU peak; f32 accumulation either way)
    returns: [N, F_out] float32
    """
    n, f_in = x.shape
    kw, f_in_w, f_out = weights.shape
    if k is None:
        k = kw
    assert kw == k and f_in_w == f_in and adj.shape == (n, n)

    if single_param:                      # all terms share linears[0]
        weights = jnp.broadcast_to(weights[:1], (k, f_in, f_out))
    if bias is None:
        bias = jnp.zeros((f_out,), jnp.float32)

    cd = compute_dtype
    csz = jnp.dtype(cd).itemsize

    # pad to lane-dense / 128-aligned shapes
    fin_p = _round_up(f_in, 128)
    fout_p = _round_up(f_out, 128)
    n_p = _round_up(n, 128)

    tm = _pick_tile(n_p, _round_up(block_rows, 128))
    tk = _pick_tile(n_p, _round_up(block_red, 128))

    x_p = jnp.pad(x, ((0, n_p - n), (0, fin_p - f_in))).astype(cd)
    adj_p = jnp.pad(adj, ((0, n_p - n), (0, n_p - n))).astype(cd)
    w_p = jnp.pad(weights, ((0, 0), (0, fin_p - f_in), (0, fout_p - f_out))).astype(cd)
    b_p = jnp.pad(bias.astype(jnp.float32), ((0, fout_p - f_out),)).reshape(1, fout_p)

    # ---- explicit VMEM budget (v7x: 64 MiB physical) -----------------------------------
    vmem_need = (
        2 * tm * tk * csz                   # adj tile, double-buffered
        + 2 * n_p * fin_p * csz             # x (resident)
        + 2 * k * fin_p * fout_p * csz      # weights (resident)
        + 2 * n_p * fout_p * 4              # output accumulator (resident)
        + tm * fin_p * 4                    # matmul accumulator scratch
        + n_p * fin_p * (csz + 3 * 4)       # recurrence state scratch
        + (2 << 20)                         # slack
    )
    vmem_limit = int(min(64 * 1024 * 1024, max(vmem_need, 16 * 1024 * 1024)))

    cost = pl.CostEstimate(
        flops=int(2 * max(k - 1, 0) * n_p * n_p * fin_p + 2 * k * n_p * fin_p * fout_p),
        transcendentals=0,
        bytes_accessed=int(n_p * n_p * csz + n_p * fin_p * csz
                           + k * fin_p * fout_p * csz + n_p * fout_p * 4),
    )

    if k == 1:
        out_p = pl.pallas_call(
            _linear_bias_kernel,
            out_shape=jax.ShapeDtypeStruct((n_p, fout_p), jnp.float32),
            grid_spec=pltpu.PrefetchScalarGridSpec(
                num_scalar_prefetch=0,
                grid=(n_p // tm,),
                in_specs=[
                    pl.BlockSpec((tm, fin_p), lambda i: (i, 0)),
                    pl.BlockSpec((1, fin_p, fout_p), lambda i: (0, 0, 0)),
                    pl.BlockSpec((1, fout_p), lambda i: (0, 0)),
                ],
                out_specs=pl.BlockSpec((tm, fout_p), lambda i: (i, 0)),
            ),
            compiler_params=pltpu.CompilerParams(
                dimension_semantics=("parallel",),
                vmem_limit_bytes=vmem_limit,
            ),
            cost_estimate=cost,
        )(x_p, w_p, b_p)
        return out_p[:n, :f_out]

    nsteps = k - 1
    kernel = functools.partial(_cheb_kernel, tm=tm, tk=tk, nsteps=nsteps)

    out_p = pl.pallas_call(
        kernel,
        out_shape=jax.ShapeDtypeStruct((n_p, fout_p), jnp.float32),
        grid_spec=pltpu.PrefetchScalarGridSpec(
            num_scalar_prefetch=0,
            grid=(nsteps, n_p // tm, n_p // tk),
            in_specs=[
                pl.BlockSpec((n_p, fin_p), lambda s, i, r: (0, 0)),           # x (resident)
                pl.BlockSpec((tm, tk), lambda s, i, r: (i, r)),               # adj tile
                pl.BlockSpec((k, fin_p, fout_p), lambda s, i, r: (0, 0, 0)),  # weights
                pl.BlockSpec((1, fout_p), lambda s, i, r: (0, 0)),            # bias
            ],
            out_specs=pl.BlockSpec((n_p, fout_p), lambda s, i, r: (0, 0)),    # resident acc
            scratch_shapes=[
                pltpu.VMEM((tm, fin_p), jnp.float32),    # adj @ T accumulator
                pltpu.VMEM((n_p, fin_p), cd),            # T_{s-1} (compute dtype)
                pltpu.VMEM((n_p, fin_p), jnp.float32),   # T_{s-1} (f32)
                pltpu.VMEM((n_p, fin_p), jnp.float32),   # T_{s-2} (f32)
                pltpu.VMEM((n_p, fin_p), jnp.float32),   # T_s being built (f32)
            ],
        ),
        compiler_params=pltpu.CompilerParams(
            # recurrence forces sequential execution; see module docstring re: megacore
            dimension_semantics=("arbitrary", "arbitrary", "arbitrary"),
            vmem_limit_bytes=vmem_limit,
        ),
        cost_estimate=cost,
    )(x_p, adj_p, w_p, b_p)

    return out_p[:n, :f_out]


# --------------------------------------------------------------------------------------
# Init + reference
# --------------------------------------------------------------------------------------
def init_params(key, in_features, out_features, k, with_bias=True):
    """Mirrors ChebConvolution.reset_parameters(): xavier_uniform_ on weight.T, bias zero."""
    bound = math.sqrt(6.0 / (in_features + out_features))
    keys = jax.random.split(key, k)
    weights = jnp.stack(
        [jax.random.uniform(keys[i], (in_features, out_features),
                            minval=-bound, maxval=bound, dtype=jnp.float32)
         for i in range(k)], axis=0)
    bias = jnp.zeros((out_features,), jnp.float32) if with_bias else None
    return weights, bias


def cheb_reference(x, adj, weights, bias, *, k, compute_dtype=jnp.float32):
    """Pure-JAX reference. With compute_dtype=f32 it is the exact PyTorch forward;
    with bf16 it mimics the kernel's mixed-precision strategy (bf16 operands, f32 acc)."""
    cd = compute_dtype
    f32 = jnp.float32
    x_c = x.astype(cd)
    adj_c = adj.astype(cd)
    w_c = weights.astype(cd)

    t0 = x_c.astype(f32)
    out = jnp.dot(x_c, w_c[0], preferred_element_type=f32)
    if k > 1:
        t1 = jnp.dot(adj_c, x_c, preferred_element_type=f32)
        out = out + jnp.dot(t1.astype(cd), w_c[1], preferred_element_type=f32)
        tpp, tprev = t0, t1
        for s in range(2, k):
            t_new = 2.0 * jnp.dot(adj_c, tprev.astype(cd),
                                  preferred_element_type=f32) - tpp
            out = out + jnp.dot(t_new.astype(cd), w_c[s], preferred_element_type=f32)
            tpp, tprev = tprev, t_new
    if bias is not None:
        out = out + bias.astype(f32)
    return out


# --------------------------------------------------------------------------------------
# Demo / self-test
# --------------------------------------------------------------------------------------
if __name__ == "__main__":
    key = jax.random.PRNGKey(0)
    k_x, k_adj, k_param = jax.random.split(key, 3)

    N = 200            # nodes (not a multiple of 128 -> exercises padding)
    IN_FEATURES = 48
    OUT_FEATURES = 96
    K = 3              # Chebyshev order (module default is 2; 3 exercises the recurrence)

    x = jax.random.normal(k_x, (N, IN_FEATURES), dtype=jnp.float32)
    a = jax.random.normal(k_adj, (N, N), dtype=jnp.float32)
    adj = (a + a.T) / (2.0 * math.sqrt(N))   # symmetric "normalized adjacency"-like matrix

    weights, bias = init_params(k_param, IN_FEATURES, OUT_FEATURES, K, with_bias=True)

    # fast path: bf16 MXU operands, f32 accumulation; small tiles to exercise the 3-D grid
    out_bf16 = cheb_convolution(x, adj, weights, bias, k=K,
                                compute_dtype=jnp.bfloat16,
                                block_rows=128, block_red=128)
    out_bf16 = jax.block_until_ready(out_bf16)
    assert out_bf16.shape == (N, OUT_FEATURES)

    ref_bf16 = cheb_reference(x, adj, weights, bias, k=K, compute_dtype=jnp.bfloat16)
    assert jnp.allclose(out_bf16, ref_bf16, atol=5e-3, rtol=5e-3), "bf16 kernel vs bf16 ref"

    ref_f32 = cheb_reference(x, adj, weights, bias, k=K, compute_dtype=jnp.float32)
    assert jnp.allclose(out_bf16, ref_f32, atol=0.25, rtol=0.25), "bf16 kernel vs f32 ref"

    # exact path: f32 operands everywhere
    out_f32 = cheb_convolution(x, adj, weights, bias, k=K,
                               compute_dtype=jnp.float32,
                               block_rows=128, block_red=128)
    out_f32 = jax.block_until_ready(out_f32)
    assert jnp.allclose(out_f32, ref_f32, atol=2e-2, rtol=2e-2), "f32 kernel vs f32 ref"

    # K == 1 fallback path (out = x @ W0 + bias)
    out_k1 = cheb_convolution(x, adj, weights[:1], bias, k=1, compute_dtype=jnp.float32)
    out_k1 = jax.block_until_ready(out_k1)
    ref_k1 = cheb_reference(x, adj, weights[:1], bias, k=1, compute_dtype=jnp.float32)
    assert jnp.allclose(out_k1, ref_k1, atol=2e-2, rtol=2e-2), "k=1 kernel vs f32 ref"

    print("KERNEL_OK")
</pallas_src>

<mosaic_0001>
module attributes {stable_mosaic.version = 11 : i64} {
  func.func @_cheb_kernel(%arg0: i32, %arg1: i32, %arg2: i32, %arg3: memref<256x128xbf16, #tpu.memory_space<vmem>>, %arg4: memref<128x128xbf16, #tpu.memory_space<vmem>>, %arg5: memref<3x128x128xbf16, #tpu.memory_space<vmem>>, %arg6: memref<1x128xf32, #tpu.memory_space<vmem>>, %arg7: memref<256x128xf32, #tpu.memory_space<vmem>>, %arg8: memref<128x128xf32, #tpu.memory_space<vmem>>, %arg9: memref<256x128xbf16, #tpu.memory_space<vmem>>, %arg10: memref<256x128xf32, #tpu.memory_space<vmem>>, %arg11: memref<256x128xf32, #tpu.memory_space<vmem>>, %arg12: memref<256x128xf32, #tpu.memory_space<vmem>>) attributes {dimension_semantics = [#tpu.dimension_semantics<arbitrary>, #tpu.dimension_semantics<arbitrary>, #tpu.dimension_semantics<arbitrary>], iteration_bounds = array<i64: 2, 2, 2>, scalar_prefetch = 0 : i64, scratch_operands = 5 : i64, tpu.core_type = #tpu.core_type<tc>, window_params = [{pipeline_mode = #tpu.pipeline_mode<synchronous>, transform_indices = @transform_0, window_bounds = array<i64: 256, 128>}, {transform_indices = @transform_1, window_bounds = array<i64: 128, 128>}, {pipeline_mode = #tpu.pipeline_mode<synchronous>, transform_indices = @transform_2, window_bounds = array<i64: 3, 128, 128>}, {pipeline_mode = #tpu.pipeline_mode<synchronous>, transform_indices = @transform_3, window_bounds = array<i64: 1, 128>}, {pipeline_mode = #tpu.pipeline_mode<synchronous>, transform_indices = @transform_4, window_bounds = array<i64: 256, 128>}]} {
    %c128_i32 = arith.constant 128 : i32
    %0 = arith.muli %arg1, %c128_i32 : i32
    %1 = tpu.assume_multiple %0, 128 : i32
    %c128_i32_0 = arith.constant 128 : i32
    %2 = arith.muli %arg2, %c128_i32_0 : i32
    %3 = tpu.assume_multiple %2, 128 : i32
    %c0_i32 = arith.constant 0 : i32
    %4 = arith.cmpi eq, %arg0, %c0_i32 : i32
    %c0_i32_1 = arith.constant 0 : i32
    %5 = arith.cmpi eq, %arg1, %c0_i32_1 : i32
    %6 = arith.andi %4, %5 : i1
    %c0_i32_2 = arith.constant 0 : i32
    %7 = arith.cmpi eq, %arg2, %c0_i32_2 : i32
    %8 = arith.andi %6, %7 : i1
    %9 = arith.extui %8 : i1 to i32
    %c0_i32_3 = arith.constant 0 : i32
    %10 = arith.cmpi ne, %9, %c0_i32_3 : i32
    scf.if %10 {
      %c0_20 = arith.constant 0 : index
      %c0_21 = arith.constant 0 : index
      %37 = vector.load %arg3[%c0_20, %c0_21] : memref<256x128xbf16, #tpu.memory_space<vmem>>, vector<256x128xbf16>
      %c0_22 = arith.constant 0 : index
      %c0_23 = arith.constant 0 : index
      %38 = vector.load %arg9[%c0_22, %c0_23] : memref<256x128xbf16, #tpu.memory_space<vmem>>, vector<256x128xbf16>
      tpu.vector_store %arg9[%c0_22, %c0_23], %37 {strides = array<i32>} : memref<256x128xbf16, #tpu.memory_space<vmem>>, vector<256x128xbf16>,
      %39 = arith.extf %37 : vector<256x128xbf16> to vector<256x128xf32>
      %c0_24 = arith.constant 0 : index
      %c0_25 = arith.constant 0 : index
      %40 = vector.load %arg10[%c0_24, %c0_25] : memref<256x128xf32, #tpu.memory_space<vmem>>, vector<256x128xf32>
      tpu.vector_store %arg10[%c0_24, %c0_25], %39 {strides = array<i32>} : memref<256x128xf32, #tpu.memory_space<vmem>>, vector<256x128xf32>,
    } else {
    }
    %c0_i32_4 = arith.constant 0 : i32
    %11 = arith.cmpi eq, %arg0, %c0_i32_4 : i32
    %c0_i32_5 = arith.constant 0 : i32
    %12 = arith.cmpi eq, %arg2, %c0_i32_5 : i32
    %13 = arith.andi %11, %12 : i1
    %14 = arith.extui %13 : i1 to i32
    %c0_i32_6 = arith.constant 0 : i32
    %15 = arith.cmpi ne, %14, %c0_i32_6 : i32
    scf.if %15 {
      %37 = arith.index_cast %1 : i32 to index
      %c0_20 = arith.constant 0 : index
      %38 = vector.load %arg3[%37, %c0_20] : memref<256x128xbf16, #tpu.memory_space<vmem>>, vector<128x128xbf16>
      %c0_21 = arith.constant 0 : index
      %c0_22 = arith.constant 0 : index
      %c0_23 = arith.constant 0 : index
      %39 = vector.load %arg5[%c0_21, %c0_22, %c0_23] : memref<3x128x128xbf16, #tpu.memory_space<vmem>>, vector<1x128x128xbf16>
      %40 = vector.shape_cast %39 : vector<1x128x128xbf16> to vector<128x128xbf16>
      %cst_24 = arith.constant dense<0.000000e+00> : vector<128x128xf32>
      %41 = tpu.matmul %38, %40, %cst_24 {dimension_numbers = #tpu.dot_dimension_numbers<[1], [0], [0], [1], [0, 0, 1, 1], [], []>} : vector<128x128xbf16>, vector<128x128xbf16>, vector<128x128xf32> -> vector<128x128xf32>
      %c0_25 = arith.constant 0 : index
      %c0_26 = arith.constant 0 : index
      %42 = vector.load %arg6[%c0_25, %c0_26] : memref<1x128xf32, #tpu.memory_space<vmem>>, vector<1x128xf32>
      %43 = vector.broadcast %42 : vector<1x128xf32> to vector<128x128xf32>
      %44 = arith.addf %41, %43 : vector<128x128xf32>
      %45 = arith.index_cast %1 : i32 to index
      %c0_27 = arith.constant 0 : index
      %46 = vector.load %arg7[%45, %c0_27] : memref<256x128xf32, #tpu.memory_space<vmem>>, vector<128x128xf32>
      tpu.vector_store %arg7[%45, %c0_27], %44 {strides = array<i32>} : memref<256x128xf32, #tpu.memory_space<vmem>>, vector<128x128xf32>,
    } else {
    }
    %c0_i32_7 = arith.constant 0 : i32
    %16 = arith.cmpi eq, %arg2, %c0_i32_7 : i32
    %17 = arith.extui %16 : i1 to i32
    %c0_i32_8 = arith.constant 0 : i32
    %18 = arith.cmpi ne, %17, %c0_i32_8 : i32
    scf.if %18 {
      %cst_20 = arith.constant 0.000000e+00 : f32
      %37 = vector.broadcast %cst_20 : f32 to vector<128x128xf32>
      %c0_21 = arith.constant 0 : index
      %c0_22 = arith.constant 0 : index
      %38 = vector.load %arg8[%c0_21, %c0_22] : memref<128x128xf32, #tpu.memory_space<vmem>>, vector<128x128xf32>
      tpu.vector_store %arg8[%c0_21, %c0_22], %37 {strides = array<i32>} : memref<128x128xf32, #tpu.memory_space<vmem>>, vector<128x128xf32>,
    } else {
    }
    %c0 = arith.constant 0 : index
    %c0_9 = arith.constant 0 : index
    %19 = vector.load %arg8[%c0, %c0_9] : memref<128x128xf32, #tpu.memory_space<vmem>>, vector<128x128xf32>
    %c0_10 = arith.constant 0 : index
    %c0_11 = arith.constant 0 : index
    %20 = vector.load %arg4[%c0_10, %c0_11] : memref<128x128xbf16, #tpu.memory_space<vmem>>, vector<128x128xbf16>
    %21 = arith.index_cast %3 : i32 to index
    %c0_12 = arith.constant 0 : index
    %22 = vector.load %arg9[%21, %c0_12] : memref<256x128xbf16, #tpu.memory_space<vmem>>, vector<128x128xbf16>
    %cst = arith.constant dense<0.000000e+00> : vector<128x128xf32>
    %23 = tpu.matmul %20, %22, %cst {dimension_numbers = #tpu.dot_dimension_numbers<[1], [0], [0], [1], [0, 0, 1, 1], [], []>} : vector<128x128xbf16>, vector<128x128xbf16>, vector<128x128xf32> -> vector<128x128xf32>
    %24 = arith.addf %19, %23 : vector<128x128xf32>
    %c0_13 = arith.constant 0 : index
    %c0_14 = arith.constant 0 : index
    %25 = vector.load %arg8[%c0_13, %c0_14] : memref<128x128xf32, #tpu.memory_space<vmem>>, vector<128x128xf32>
    tpu.vector_store %arg8[%c0_13, %c0_14], %24 {strides = array<i32>} : memref<128x128xf32, #tpu.memory_space<vmem>>, vector<128x128xf32>,
    %c1_i32 = arith.constant 1 : i32
    %26 = arith.cmpi eq, %arg2, %c1_i32 : i32
    %27 = arith.extui %26 : i1 to i32
    %c0_i32_15 = arith.constant 0 : i32
    %28 = arith.cmpi ne, %27, %c0_i32_15 : i32
    scf.if %28 {
      %c0_i32_20 = arith.constant 0 : i32
      %37 = arith.cmpi eq, %arg0, %c0_i32_20 : i32
      %38 = arith.extui %37 : i1 to i32
      %c0_i32_21 = arith.constant 0 : i32
      %39 = arith.cmpi ne, %38, %c0_i32_21 : i32
      scf.if %39 {
        %c0_24 = arith.constant 0 : index
        %c0_25 = arith.constant 0 : index
        %43 = vector.load %arg8[%c0_24, %c0_25] : memref<128x128xf32, #tpu.memory_space<vmem>>, vector<128x128xf32>
        %44 = arith.index_cast %1 : i32 to index
        %c0_26 = arith.constant 0 : index
        %45 = vector.load %arg12[%44, %c0_26] : memref<256x128xf32, #tpu.memory_space<vmem>>, vector<128x128xf32>
        tpu.vector_store %arg12[%44, %c0_26], %43 {strides = array<i32>} : memref<256x128xf32, #tpu.memory_space<vmem>>, vector<128x128xf32>,
        %46 = arith.index_cast %1 : i32 to index
        %c0_27 = arith.constant 0 : index
        %47 = vector.load %arg7[%46, %c0_27] : memref<256x128xf32, #tpu.memory_space<vmem>>, vector<128x128xf32>
        %48 = arith.truncf %43 : vector<128x128xf32> to vector<128x128xbf16>
        %c1_i32_28 = arith.constant 1 : i32
        %49 = arith.addi %arg0, %c1_i32_28 : i32
        %50 = arith.index_cast %49 : i32 to index
        %c0_29 = arith.constant 0 : index
        %c0_30 = arith.constant 0 : index
        %51 = vector.load %arg5[%50, %c0_29, %c0_30] : memref<3x128x128xbf16, #tpu.memory_space<vmem>>, vector<1x128x128xbf16>
        %52 = vector.shape_cast %51 : vector<1x128x128xbf16> to vector<128x128xbf16>
        %cst_31 = arith.constant dense<0.000000e+00> : vector<128x128xf32>
        %53 = tpu.matmul %48, %52, %cst_31 {dimension_numbers = #tpu.dot_dimension_numbers<[1], [0], [0], [1], [0, 0, 1, 1], [], []>} : vector<128x128xbf16>, vector<128x128xbf16>, vector<128x128xf32> -> vector<128x128xf32>
        %54 = arith.addf %47, %53 : vector<128x128xf32>
        %55 = arith.index_cast %1 : i32 to index
        %c0_32 = arith.constant 0 : index
        %56 = vector.load %arg7[%55, %c0_32] : memref<256x128xf32, #tpu.memory_space<vmem>>, vector<128x128xf32>
        tpu.vector_store %arg7[%55, %c0_32], %54 {strides = array<i32>} : memref<256x128xf32, #tpu.memory_space<vmem>>, vector<128x128xf32>,
      } else {
      }
      %c0_i32_22 = arith.constant 0 : i32
      %40 = arith.cmpi sgt, %arg0, %c0_i32_22 : i32
      %41 = arith.extui %40 : i1 to i32
      %c0_i32_23 = arith.constant 0 : i32
      %42 = arith.cmpi ne, %41, %c0_i32_23 : i32
      scf.if %42 {
        %c0_24 = arith.constant 0 : index
        %c0_25 = arith.constant 0 : index
        %43 = vector.load %arg8[%c0_24, %c0_25] : memref<128x128xf32, #tpu.memory_space<vmem>>, vector<128x128xf32>
        %cst_26 = arith.constant 2.000000e+00 : f32
        %44 = vector.broadcast %cst_26 : f32 to vector<128x128xf32>
        %45 = arith.mulf %44, %43 : vector<128x128xf32>
        %46 = arith.index_cast %1 : i32 to index
        %c0_27 = arith.constant 0 : index
        %47 = vector.load %arg11[%46, %c0_27] : memref<256x128xf32, #tpu.memory_space<vmem>>, vector<128x128xf32>
        %48 = arith.subf %45, %47 : vector<128x128xf32>
        %49 = arith.index_cast %1 : i32 to index
        %c0_28 = arith.constant 0 : index
        %50 = vector.load %arg12[%49, %c0_28] : memref<256x128xf32, #tpu.memory_space<vmem>>, vector<128x128xf32>
        tpu.vector_store %arg12[%49, %c0_28], %48 {strides = array<i32>} : memref<256x128xf32, #tpu.memory_space<vmem>>, vector<128x128xf32>,
        %51 = arith.index_cast %1 : i32 to index
        %c0_29 = arith.constant 0 : index
        %52 = vector.load %arg7[%51, %c0_29] : memref<256x128xf32, #tpu.memory_space<vmem>>, vector<128x128xf32>
        %53 = arith.truncf %48 : vector<128x128xf32> to vector<128x128xbf16>
        %c1_i32_30 = arith.constant 1 : i32
        %54 = arith.addi %arg0, %c1_i32_30 : i32
        %55 = arith.index_cast %54 : i32 to index
        %c0_31 = arith.constant 0 : index
        %c0_32 = arith.constant 0 : index
        %56 = vector.load %arg5[%55, %c0_31, %c0_32] : memref<3x128x128xbf16, #tpu.memory_space<vmem>>, vector<1x128x128xbf16>
        %57 = vector.shape_cast %56 : vector<1x128x128xbf16> to vector<128x128xbf16>
        %cst_33 = arith.constant dense<0.000000e+00> : vector<128x128xf32>
        %58 = tpu.matmul %53, %57, %cst_33 {dimension_numbers = #tpu.dot_dimension_numbers<[1], [0], [0], [1], [0, 0, 1, 1], [], []>} : vector<128x128xbf16>, vector<128x128xbf16>, vector<128x128xf32> -> vector<128x128xf32>
        %59 = arith.addf %52, %58 : vector<128x128xf32>
        %60 = arith.index_cast %1 : i32 to index
        %c0_34 = arith.constant 0 : index
        %61 = vector.load %arg7[%60, %c0_34] : memref<256x128xf32, #tpu.memory_space<vmem>>, vector<128x128xf32>
        tpu.vector_store %arg7[%60, %c0_34], %59 {strides = array<i32>} : memref<256x128xf32, #tpu.memory_space<vmem>>, vector<128x128xf32>,
      } else {
      }
    } else {
    }
    %c1_i32_16 = arith.constant 1 : i32
    %29 = arith.cmpi eq, %arg2, %c1_i32_16 : i32
    %c1_i32_17 = arith.constant 1 : i32
    %30 = arith.cmpi eq, %arg1, %c1_i32_17 : i32
    %31 = arith.andi %29, %30 : i1
    %c1_i32_18 = arith.constant 1 : i32
    %32 = arith.addi %arg0, %c1_i32_18 : i32
    %c2_i32 = arith.constant 2 : i32
    %33 = arith.cmpi slt, %32, %c2_i32 : i32
    %34 = arith.andi %31, %33 : i1
    %35 = arith.extui %34 : i1 to i32
    %c0_i32_19 = arith.constant 0 : i32
    %36 = arith.cmpi ne, %35, %c0_i32_19 : i32
    scf.if %36 {
      %c0_20 = arith.constant 0 : index
      %c0_21 = arith.constant 0 : index
      %37 = vector.load %arg10[%c0_20, %c0_21] : memref<256x128xf32, #tpu.memory_space<vmem>>, vector<256x128xf32>
      %c0_22 = arith.constant 0 : index
      %c0_23 = arith.constant 0 : index
      %38 = vector.load %arg11[%c0_22, %c0_23] : memref<256x128xf32, #tpu.memory_space<vmem>>, vector<256x128xf32>
      tpu.vector_store %arg11[%c0_22, %c0_23], %37 {strides = array<i32>} : memref<256x128xf32, #tpu.memory_space<vmem>>, vector<256x128xf32>,
      %c0_24 = arith.constant 0 : index
      %c0_25 = arith.constant 0 : index
      %39 = vector.load %arg12[%c0_24, %c0_25] : memref<256x128xf32, #tpu.memory_space<vmem>>, vector<256x128xf32>
      %c0_26 = arith.constant 0 : index
      %c0_27 = arith.constant 0 : index
      %40 = vector.load %arg10[%c0_26, %c0_27] : memref<256x128xf32, #tpu.memory_space<vmem>>, vector<256x128xf32>
      tpu.vector_store %arg10[%c0_26, %c0_27], %39 {strides = array<i32>} : memref<256x128xf32, #tpu.memory_space<vmem>>, vector<256x128xf32>,
      %41 = arith.truncf %39 : vector<256x128xf32> to vector<256x128xbf16>
      %c0_28 = arith.constant 0 : index
      %c0_29 = arith.constant 0 : index
      %42 = vector.load %arg9[%c0_28, %c0_29] : memref<256x128xbf16, #tpu.memory_space<vmem>>, vector<256x128xbf16>
      tpu.vector_store %arg9[%c0_28, %c0_29], %41 {strides = array<i32>} : memref<256x128xbf16, #tpu.memory_space<vmem>>, vector<256x128xbf16>,
    } else {
    }
    return
  }
  func.func @transform_0(%arg0: i32, %arg1: i32, %arg2: i32) -> (i32, i32) {
    %c0_i32 = arith.constant 0 : i32
    %c0_i32_0 = arith.constant 0 : i32
    %c0_i32_1 = arith.constant 0 : i32
    return %c0_i32, %c0_i32_0 : i32, i32
  }
  func.func @transform_1(%arg0: i32, %arg1: i32, %arg2: i32) -> (i32, i32) {
    %c0_i32 = arith.constant 0 : i32
    return %arg1, %arg2 : i32, i32
  }
  func.func @transform_2(%arg0: i32, %arg1: i32, %arg2: i32) -> (i32, i32, i32) {
    %c0_i32 = arith.constant 0 : i32
    %c0_i32_0 = arith.constant 0 : i32
    %c0_i32_1 = arith.constant 0 : i32
    %c0_i32_2 = arith.constant 0 : i32
    return %c0_i32, %c0_i32_0, %c0_i32_1 : i32, i32, i32
  }
  func.func @transform_3(%arg0: i32, %arg1: i32, %arg2: i32) -> (i32, i32) {
    %c0_i32 = arith.constant 0 : i32
    %c0_i32_0 = arith.constant 0 : i32
    %c0_i32_1 = arith.constant 0 : i32
    return %c0_i32, %c0_i32_0 : i32, i32
  }
  func.func @transform_4(%arg0: i32, %arg1: i32, %arg2: i32) -> (i32, i32) {
    %c0_i32 = arith.constant 0 : i32
    %c0_i32_0 = arith.constant 0 : i32
    %c0_i32_1 = arith.constant 0 : i32
    return %c0_i32, %c0_i32_0 : i32, i32
  }
}

</mosaic_0001>

<bundles_post_ra>
// kernel: tpu_custom_call.1
= control target key start
LH: loop header
LB: loop body
LE: loop exit
PB: predicated region body
PF: predicated region fallthrough
CT: control target
= control target key end

     0   :  { %s3201_s0 = inlined_call_operand.hbm [shape: bf16[256,128], index: 0, kind: input, shape index: {}]   ;;  %s3202_s1 = inlined_call_operand.hbm [shape: bf16[256,256], index: 1, kind: input, shape index: {}]   ;;  %s3203_s2 = inlined_call_operand.hbm [shape: bf16[3,128,128], index: 2, kind: input, shape index: {}]   ;;  %s3204_s3 = inlined_call_operand.vmem [shape: f32[1,128], index: 3, kind: input, shape index: {}]   ;;  %s3205_s4 = inlined_call_operand.hbm [shape: f32[256,128], index: 4, kind: output, shape index: {}]  }
   0x1   :  { %3213 = sst [smem:[#allocation18_spill]] %s3201_s0 }
   0x2   :  { %3214 = sst [smem:[#allocation19_spill]] %s3204_s3 }
   0x3   :  { %3215 = sst [smem:[#allocation20_spill]] %s3205_s4 }
   0x4   :  { %9 = vsyncpa [#allocation8], 0 }
   0x5   :  { %10 = vsyncpa [#allocation11], 0 }
   0x6   :  { %12 = vsyncpa [#allocation11 + $0x1], 0 }
   0x7   :  { %13 = vsyncpa [#allocation9], 0  ;;  %s2644_s15 = smov 0   ;;  %s2646_s16 = smov 0  }
   0x8   :  { %s2648_s17 = smov 0   ;;  %s2650_s18 = smov 0  }
   0x9   :  { %s2652_s19 = smov 0   ;;  %s2654_s20 = smov 0  }
   0xa   :  { %s2656_s21 = smov 0   ;;  %s2658_s22 = smov 0  }
   0xb   :  { %s2660_s23 = smov 0   ;;  %s2662_s24 = smov 0  }
   0xc LB: > { %s2693_s25 = sadd.s32 4294967295, %s2607_s24   ;;  %p75_p0 = scmp.ne.s32.totalorder %s2579_s17, %s2575_s16  ;;  %s2607_s24 = sphi %s2662_s24, %s19_s24   ;;  %s2603_s23 = sphi %s2660_s23, %s3242_s23   ;;  %s2599_s22 = sphi %s2658_s22, %s3241_s22   ;;  %s2595_s21 = sphi %s2656_s21, %s3240_s21   ;;  %s2591_s20 = sphi %s2654_s20, %s3239_s20   ;;  %s2587_s19 = sphi %s2652_s19, %s3238_s19   ;;  %s2583_s18 = sphi %s2650_s18, %s3237_s18   ;;  %s2579_s17 = sphi %s2648_s17, %s3236_s17   ;;  %s2575_s16 = sphi %s2646_s16, %s3235_s16   ;;  %s2571_s15 = sphi %s2644_s15, %s3234_s15  }
   0xd   : > { %p76_p1 = scmp.eq.s32.totalorder %s2607_s24, 0  ;;  %p81_p2 = scmp.ne.s32.totalorder %s2575_s16, %s2571_s15 }
   0xe   : > { %p3206_p3 = scmp.eq.s32.totalorder %s2693_s25, 0  ;;  %p1836_p5 = scmp.ge.s32.totalorder %s2607_s24, 1 }
   0xf   : > { %p77_p4 = por %p76_p1, %p75_p0  ;;  %p155_p7 = scmp.lt.s32.totalorder %s2607_s24, 9 }
  0x10   : > { %p2704_p6 = por %p3206_p3, %p81_p2  ;;  %s2609_s29 = smov [#allocation12]  }
  0x11   : > { %p2709_p8 = pnand %p1836_p5, %p155_p7  ;;  %s180_s30 = sshll.u32 %s2609_s29, 4  ;;  %s181_s30 = int_to_ptr.vmem [resolvable:$true] %s180_s30 }
  0x12   : > { %s3216_s27 = scalar_select %p2704_p6, 1, 0 }
  0x13   : > { %s3217_s28 = scalar_select %p2709_p8, 1, 0 }
  0x14   : > { %p2222_p9 = pneg %p2709_p8  ;;  %p2235_p10 = scmp.lt.s32.totalorder %s2607_s24, 8 }
  0x15   : > { %s2401_s9 = scalar_lea.hbm %s3203_s2, 3072 }
  0x16   : > { %p2718_p11 = pnand %p2222_p9, %p3206_p3  ;;  %p2722_p12 = pnand %p2235_p10, %p77_p4 }
  0x17   : > { %p2402_p13 = scmp.ne.s32.totalorder %s3203_s2, %s2401_s9  ;;  %p2408_p4 = scmp.lt.u32.totalorder %s2401_s9, %s3203_s2 }
  0x18   : > { %s3219_s6 = scalar_select %p2722_p12, 1, 0 }
  0x19   : > { %p2403_p0 = pneg %p2718_p11 }
  0x1b   : > { %p2404_p1 = pnand %p2403_p0, %p2402_p13 }
  0x1d   : > { %p2405_p2 = pneg %p2404_p1 }
  0x1f   : > { %p2410_p5 = pnand %p2408_p4, %p2405_p2 }
  0x21   : > { %2413 = shalt.err (!%p2410_p5)
}
  0x22   : > { %s2414_s14 = scalar_lea.vmem %s181_s30, 3072  ;;  %p2422_p3 = scmp.lt.s32.totalorder %s181_s30, %s181_s30 }
  0x23   : > { %p2415_p7 = scmp.ne.s32.totalorder %s181_s30, %s2414_s14  ;;  %p2423_p6 = scmp.lt.s32.totalorder %s2414_s14, %s2414_s14 }
  0x25   : > { %p2417_p9 = pnand %p2415_p7, %p2403_p0  ;;  %p2424_p8 = por %p2423_p6, %p2422_p3 }
  0x27   : > { %p2418_p10 = pneg %p2417_p9 }
  0x29   : > { %p2425_p12 = pnand %p2424_p8, %p2418_p10 }
  0x2b   : > { %2428 = shalt.err (!%p2425_p12)
}
  0x2c   : > { %s3211_s15 = smov 64   ;;  %s3212_s29 = smov 4  }
  0x2d   : > { %2228 = dma.hbm_to_vmem [thread:$0]  (!%p2718_p11), %s3203_s2, 3072, %s181_s30, [#allocation11], %s3211_s15, %s3211_s15, %s3212_s29  }
  0x2e   : > { %s2612_s9 = smov [#allocation7]   ;;  %s3220_s0 = sld [smem:[#allocation18_spill]] }
  0x2f   : > { %s167_s10 = sshll.u32 %s2612_s9, 4  ;;  %s168_s10 = int_to_ptr.vmem [resolvable:$true] %s167_s10 }
  0x34   : > { %s2429_s13 = scalar_lea.hbm %s3220_s0, 2048 }
  0x35   : > { %p2430_p3 = scmp.ne.s32.totalorder %s3220_s0, %s2429_s13  ;;  %p2436_p12 = scmp.lt.u32.totalorder %s2429_s13, %s3220_s0 }
  0x37   : > { %p2432_p6 = pnand %p2430_p3, %p2403_p0 }
  0x39   : > { %p2433_p8 = pneg %p2432_p6 }
  0x3b   : > { %p2438_p13 = pnand %p2436_p12, %p2433_p8 }
  0x3d   : > { %2441 = shalt.err (!%p2438_p13)
}
  0x3e   : > { %s2442_s30 = scalar_lea.vmem %s168_s10, 2048  ;;  %p2450_p5 = scmp.lt.s32.totalorder %s168_s10, %s168_s10 }
  0x3f   : > { %p2443_p1 = scmp.ne.s32.totalorder %s168_s10, %s2442_s30  ;;  %p2451_p7 = scmp.lt.s32.totalorder %s2442_s30, %s2442_s30 }
  0x41   : > { %p2445_p2 = pnand %p2443_p1, %p2403_p0  ;;  %p2452_p9 = por %p2451_p7, %p2450_p5 }
  0x43   : > { %p2446_p4 = pneg %p2445_p2 }
  0x45   : > { %p2453_p10 = pnand %p2452_p9, %p2446_p4 }
  0x47   : > { %2456 = shalt.err (!%p2453_p10)
}
  0x48   : > { %2225 = dma.hbm_to_vmem [thread:$0]  (!%p2718_p11), %s3220_s0, 2048, %s168_s10, [#allocation8], %s3211_s15, %s3211_s15, %s3212_s29  }
  0x49   : > { %s34_s26 = sadd.s32 1, %s2599_s22  ;;  %s31_s7 = sadd.s32 1, %s2595_s21 }
  0x4a   : > { %s38_s5 = sadd.s32 1, %s2603_s23  ;;  %p32_p0 = scmp.ge.s32.totalorder %s31_s7, 2 }
  0x4b   : > { %s197_s8 = sand.u32 1, %s2607_s24   ;;  %s199_s9 = sand.u32 1, %s2579_s17  }
  0x4c   : > { %s3244_s7 = smov (%p32_p0, %s31_s7), 0  ;;  %s3246_s26 = smov (!%p32_p0, %s34_s26), %s2599_s22 }
  0x4d   : > { %s64_s11 = ssub.s32 %s2595_s21, %s3244_s7  ;;  %s1840_s12 = sshll.u32 %s199_s9, 6 }
  0x4e   : > { %p36_p3 = scmp.ge.s32.totalorder %s3246_s26, 2  ;;  %s1951_s13 = sshll.u32 %s2599_s22, 5 }
  0x4f   : > { %s201_s10 = scalar_lea.vmem [#allocation10], %s1840_s12  ;;  %s207_s3 = sadd.s32 %s2595_s21, %s1951_s13 }
  0x50   : > { %s210_s14 = sshll.u32 %s201_s10, 4  ;;  %s3248_s26 = smov (%p36_p3, %s3246_s26), 0  ;;  %s2803_s14 = int_to_ptr.vmem [resolvable:$true] %s210_s14 }
  0x51   : > { %s3250_s5 = smov (!%p36_p3, %s38_s5), %s2603_s23  ;;  %s63_s30 = ssub.s32 %s2599_s22, %s3248_s26 }
  0x52   : > { %p40_p11 = scmp.ge.s32.totalorder %s3250_s5, 2  ;;  %s65_s4 = sor.u32 %s64_s11, %s63_s30 }
  0x53   : > { %p66_p6 = scmp.eq.s32.totalorder %s65_s4, 0  ;;  %s1843_s15 = sshll.u32 %s207_s3, 6 }
  0x54   : > { %s3252_s5 = smov (%p40_p11, %s3250_s5), 0  ;;  %s3221_s29 = sadd.s32 1, %s2579_s17 }
  0x55   : > { %s2796_s9 = scalar_select %p66_p6, %s2579_s17, %s3221_s29  }
  0x56   : > { %s2801_s10 = scalar_lea.hbm %s3202_s1, %s1843_s15  ;;  %s2805_s13 = scalar_lea.sflag [#allocation11], %s197_s8 }
  0x57   : > { %s2457_s11 = scalar_lea.hbm %s2801_s10, 1024  ;;  %p3222_p12 = scmp.ne.s32.totalorder %s3219_s6, 0 }
  0x58   : > { %p2458_p8 = scmp.ne.s32.totalorder %s2801_s10, %s2457_s11  ;;  %s2462_s15 = scalar_lea.hbm %s3202_s1, 4096 }
  0x59   : > { %p2459_p13 = pneg %p3222_p12  ;;  %p2463_p4 = scmp.lt.u32.totalorder %s2801_s10, %s3202_s1 }
  0x5a   : > { %p2464_p5 = scmp.lt.u32.totalorder %s2462_s15, %s2457_s11  ;;  %p2466_p9 = scmp.lt.u32.totalorder %s2457_s11, %s2801_s10 }
  0x5b   : > { %p2460_p1 = pnand %p2459_p13, %p2458_p8 }
  0x5c   : > { %p2465_p7 = por %p2464_p5, %p2463_p4 }
  0x5d   : > { %p2461_p2 = pneg %p2460_p1 }
  0x5e   : > { %p2467_p10 = por %p2466_p9, %p2465_p7 }
  0x60   : > { %p2468_p0 = pnand %p2467_p10, %p2461_p2 }
  0x62   : > { %2471 = shalt.err (!%p2468_p0)
}
  0x63   : > { %s2472_s8 = scalar_lea.vmem %s2803_s14, 1024  ;;  %s2613_s4 = smov [#allocation10]  }
  0x64   : > { %p2473_p3 = scmp.ne.s32.totalorder %s2803_s14, %s2472_s8  ;;  %s2477_s12 = sshll.u32 %s2613_s4, 4  ;;  %s2478_s12 = int_to_ptr.vmem [resolvable:$false] %s2477_s12 }
  0x65   : > { %s2479_s29 = scalar_lea.vmem %s2478_s12, 2048  ;;  %p2480_p8 = scmp.lt.s32.totalorder %s2803_s14, %s2478_s12 }
  0x66   : > { %p2475_p11 = pnand %p2473_p3, %p2459_p13  ;;  %p2481_p1 = scmp.lt.s32.totalorder %s2479_s29, %s2472_s8 }
  0x68   : > { %p2476_p6 = pneg %p2475_p11  ;;  %p2482_p4 = por %p2481_p1, %p2480_p8 }
  0x6a   : > { %p2483_p5 = pnand %p2482_p4, %p2476_p6 }
  0x6c   : > { %2486 = shalt.err (!%p2483_p5)
}
  0x6d   : > { %s2614_s11 = smov 128   ;;  %s3223_s0 = smov 4  }
  0x6e   : > { %s3224_s15 = smov 64   ;;  %p3225_p13 = scmp.ne.s32.totalorder %s3217_s28, 0 }
  0x6f   : > { %2232 = dma.hbm_to_vmem [thread:$0]  (!%p3222_p12), %s2801_s10, 1024, %s2803_s14, %s2805_s13, %s2614_s11, %s3224_s15, %s3223_s0  }
  0x70   : > { %222 = sbr.rel (%p3225_p13) target bundleno = 1299 (0x513), region = 36  ;;  %p3226_p2 = scmp.eq.s32.totalorder (!%p3225_p13), %s2693_s25, 0 }
  0x77   : > { %2554 = dma.done.wait (%p3226_p2), [#allocation8], 2048   ;;  %p3227_p7 = pmov %p3226_p2 }
  0x78   : > { %s228_s30 = sand.u32 1, %s2693_s25   ;;  %s230_s6 = sand.u32 1, %s2575_s16  }
  0x79   : > { %2556 = vsyncadd (%p3227_p7), [#allocation8], 4294965248  ;;  %s1846_s3 = sshll.u32 %s230_s6, 6  ;;  %s229_s8 = scalar_lea.sflag [#allocation11], %s228_s30 }
  0x7a   : > { %s2843_s4 = scalar_lea.vmem [#allocation10], %s1846_s3  ;;  %p3228_p9 = scmp.ne.s32.totalorder %s3216_s27, 0 }
  0x7c   : > { %2558 = dma.done.wait (%p3228_p9), %s229_s8, 1024  }
  0x7d   : > { %2560 = vsyncadd (%p3228_p9), %s229_s8, 4294966272  ;;  %p3229_p12 = pmov %p3226_p2 }
  0x7e   : > { %p3230_p10 = pmov %p3226_p2 }
  0x7f   : > { %2562 = dma.done.wait (%p3229_p12), [#allocation11], 3072  }
  0x80   : > { %2564 = vsyncadd (%p3230_p10), [#allocation11], 4294964224  ;;  %s2854_s28 = sshll.u32 %s2587_s19, 7  ;;  %s1849_s14 = sshll.u32 %s2583_s18, 7 }
  0x81   : > { %p260_p0 = scmp.eq.s32.totalorder %s2591_s20, 0  ;;  %p261_p3 = scmp.eq.s32.totalorder %s2587_s19, 0 }
  0x82   : > { %p264_p6 = scmp.eq.s32.totalorder %s2583_s18, 0 }
  0x83   : > { %p262_p11 = pnand %p261_p3, %p260_p0 }
  0x85   : > { %p263_p8 = pneg %p262_p11 }
  0x87   : > { %p265_p1 = pnand %p264_p6, %p263_p8 }
  0x88   : > { %v269_v0 = vld [vmem:[#allocation7] sm:$0xff] (!%p265_p1)   ;;  %v271_v1 = vld [vmem:[#allocation7 + $0x8] sm:$0xff] (!%p265_p1)   ;;  %v273_v2 = vld [vmem:[#allocation7 + $0x10] sm:$0xff] (!%p265_p1)  }
  0x89   : > { %268 = sbr.rel (%p265_p1) target bundleno = 163 (0xa3), region = 52  ;;  %v275_v3 = vld [vmem:[#allocation7 + $0x18] sm:$0xff] (!%p265_p1)   ;;  %v277_v4 = vld [vmem:[#allocation7 + $0x20] sm:$0xff] (!%p265_p1)   ;;  %v279_v5 = vld [vmem:[#allocation7 + $0x28] sm:$0xff] (!%p265_p1)   ;;  %v413_v6 = vunpack.c.l.bf16 (!%p265_p1), %v269_v0  ;;  %v414_v10 = vunpack.c.h.bf16 (!%p265_p1), %v269_v0  ;;  %397 = vst [vmem:[#allocation3] sm:$0xff] (!%p265_p1), %v269_v0  ;;  %v415_v14 = vunpack.c.l.bf16 (!%p265_p1), %v271_v1  ;;  %v416_v18 = vunpack.c.h.bf16 (!%p265_p1), %v271_v1 }
  0x8a   : > { %v281_v7 = vld [vmem:[#allocation7 + $0x30] sm:$0xff] (!%p265_p1)   ;;  %v283_v8 = vld [vmem:[#allocation7 + $0x38] sm:$0xff] (!%p265_p1)   ;;  %v2864_v9 = vld [vmem:[#allocation7 + $0x40] sm:$0xff] (!%p265_p1)   ;;  %398 = vst [vmem:[#allocation3 + $0x8] sm:$0xff] (!%p265_p1), %v271_v1  ;;  %v417_v20 = vunpack.c.l.bf16 (!%p265_p1), %v273_v2  ;;  %v418_v21 = vunpack.c.h.bf16 (!%p265_p1), %v273_v2  ;;  %v419_v22 = vunpack.c.l.bf16 (!%p265_p1), %v275_v3  ;;  %v420_v23 = vunpack.c.h.bf16 (!%p265_p1), %v275_v3 }
  0x8b   : > { %399 = vst [vmem:[#allocation3 + $0x10] sm:$0xff] (!%p265_p1), %v273_v2  ;;  %v287_v11 = vld [vmem:[#allocation7 + $0x48] sm:$0xff] (!%p265_p1)   ;;  %v2866_v12 = vld [vmem:[#allocation7 + $0x50] sm:$0xff] (!%p265_p1)   ;;  %v2868_v13 = vld [vmem:[#allocation7 + $0x58] sm:$0xff] (!%p265_p1)   ;;  %v421_v24 = vunpack.c.l.bf16 (!%p265_p1), %v277_v4  ;;  %v422_v25 = vunpack.c.h.bf16 (!%p265_p1), %v277_v4  ;;  %v423_v26 = vunpack.c.l.bf16 (!%p265_p1), %v279_v5  ;;  %v424_v27 = vunpack.c.h.bf16 (!%p265_p1), %v279_v5 }
  0x8c   : > { %445 = vst [vmem:[#allocation4] sm:$0xff] (!%p265_p1), %v413_v6  ;;  %400 = vst [vmem:[#allocation3 + $0x18] sm:$0xff] (!%p265_p1), %v275_v3  ;;  %v2870_v15 = vld [vmem:[#allocation7 + $0x60] sm:$0xff] (!%p265_p1)   ;;  %v2872_v16 = vld [vmem:[#allocation7 + $0x68] sm:$0xff] (!%p265_p1)   ;;  %v425_v28 = vunpack.c.l.bf16 (!%p265_p1), %v281_v7  ;;  %v426_v29 = vunpack.c.h.bf16 (!%p265_p1), %v281_v7  ;;  %v427_v30 = vunpack.c.l.bf16 (!%p265_p1), %v283_v8  ;;  %v428_v31 = vunpack.c.h.bf16 (!%p265_p1), %v283_v8 }
  0x8d   : > { %401 = vst [vmem:[#allocation3 + $0x20] sm:$0xff] (!%p265_p1), %v277_v4  ;;  %402 = vst [vmem:[#allocation3 + $0x28] sm:$0xff] (!%p265_p1), %v279_v5  ;;  %v2874_v17 = vld [vmem:[#allocation7 + $0x70] sm:$0xff] (!%p265_p1)   ;;  %v2877_v19 = vld [vmem:[#allocation7 + $0x78] sm:$0xff] (!%p265_p1)   ;;  %v429_v32 = vunpack.c.l.bf16 (!%p265_p1), %v2864_v9  ;;  %v430_v33 = vunpack.c.h.bf16 (!%p265_p1), %v2864_v9  ;;  %v431_v34 = vunpack.c.l.bf16 (!%p265_p1), %v287_v11  ;;  %v432_v35 = vunpack.c.h.bf16 (!%p265_p1), %v287_v11 }
  0x8e   : > { %446 = vst [vmem:[#allocation4 + $0x8] sm:$0xff] (!%p265_p1), %v414_v10  ;;  %403 = vst [vmem:[#allocation3 + $0x30] sm:$0xff] (!%p265_p1), %v281_v7  ;;  %v433_v36 = vunpack.c.l.bf16 (!%p265_p1), %v2866_v12  ;;  %v434_v37 = vunpack.c.h.bf16 (!%p265_p1), %v2866_v12  ;;  %v435_v38 = vunpack.c.l.bf16 (!%p265_p1), %v2868_v13  ;;  %v436_v39 = vunpack.c.h.bf16 (!%p265_p1), %v2868_v13 }
  0x8f   : > { %404 = vst [vmem:[#allocation3 + $0x38] sm:$0xff] (!%p265_p1), %v283_v8  ;;  %405 = vst [vmem:[#allocation3 + $0x40] sm:$0xff] (!%p265_p1), %v2864_v9  ;;  %v437_v40 = vunpack.c.l.bf16 (!%p265_p1), %v2870_v15  ;;  %v438_v41 = vunpack.c.h.bf16 (!%p265_p1), %v2870_v15  ;;  %v439_v42 = vunpack.c.l.bf16 (!%p265_p1), %v2872_v16  ;;  %v440_v43 = vunpack.c.h.bf16 (!%p265_p1), %v2872_v16 }
  0x90   : > { %447 = vst [vmem:[#allocation4 + $0x10] sm:$0xff] %v415_v14  ;;  %406 = vst [vmem:[#allocation3 + $0x48] sm:$0xff] %v287_v11  ;;  %v441_v44 = vunpack.c.l.bf16 %v2874_v17  ;;  %v442_v45 = vunpack.c.h.bf16 %v2874_v17  ;;  %v443_v46 = vunpack.c.l.bf16 %v2877_v19  ;;  %v444_v47 = vunpack.c.h.bf16 %v2877_v19 }
  0x91   : > { %407 = vst [vmem:[#allocation3 + $0x50] sm:$0xff] %v2866_v12  ;;  %408 = vst [vmem:[#allocation3 + $0x58] sm:$0xff] %v2868_v13 }
  0x92   : > { %448 = vst [vmem:[#allocation4 + $0x18] sm:$0xff] %v416_v18  ;;  %409 = vst [vmem:[#allocation3 + $0x60] sm:$0xff] %v2870_v15 }
  0x93   : > { %410 = vst [vmem:[#allocation3 + $0x68] sm:$0xff] %v2872_v16  ;;  %411 = vst [vmem:[#allocation3 + $0x70] sm:$0xff] %v2874_v17 }
  0x94   : > { %449 = vst [vmem:[#allocation4 + $0x20] sm:$0xff] %v417_v20  ;;  %412 = vst [vmem:[#allocation3 + $0x78] sm:$0xff] %v2877_v19 }
  0x95   : > { %450 = vst [vmem:[#allocation4 + $0x28] sm:$0xff] %v418_v21  ;;  %451 = vst [vmem:[#allocation4 + $0x30] sm:$0xff] %v419_v22 }
  0x96   : > { %452 = vst [vmem:[#allocation4 + $0x38] sm:$0xff] %v420_v23  ;;  %453 = vst [vmem:[#allocation4 + $0x40] sm:$0xff] %v421_v24 }
  0x97   : > { %454 = vst [vmem:[#allocation4 + $0x48] sm:$0xff] %v422_v25  ;;  %455 = vst [vmem:[#allocation4 + $0x50] sm:$0xff] %v423_v26 }
  0x98   : > { %456 = vst [vmem:[#allocation4 + $0x58] sm:$0xff] %v424_v27  ;;  %457 = vst [vmem:[#allocation4 + $0x60] sm:$0xff] %v425_v28 }
  0x99   : > { %458 = vst [vmem:[#allocation4 + $0x68] sm:$0xff] %v426_v29  ;;  %459 = vst [vmem:[#allocation4 + $0x70] sm:$0xff] %v427_v30 }
  0x9a   : > { %460 = vst [vmem:[#allocation4 + $0x78] sm:$0xff] %v428_v31  ;;  %461 = vst [vmem:[#allocation4 + $0x80] sm:$0xff] %v429_v32 }
  0x9b   : > { %462 = vst [vmem:[#allocation4 + $0x88] sm:$0xff] %v430_v33  ;;  %463 = vst [vmem:[#allocation4 + $0x90] sm:$0xff] %v431_v34 }
  0x9c   : > { %464 = vst [vmem:[#allocation4 + $0x98] sm:$0xff] %v432_v35  ;;  %465 = vst [vmem:[#allocation4 + $0xa0] sm:$0xff] %v433_v36 }
  0x9d   : > { %466 = vst [vmem:[#allocation4 + $0xa8] sm:$0xff] %v434_v37  ;;  %467 = vst [vmem:[#allocation4 + $0xb0] sm:$0xff] %v435_v38 }
  0x9e   : > { %468 = vst [vmem:[#allocation4 + $0xb8] sm:$0xff] %v436_v39  ;;  %469 = vst [vmem:[#allocation4 + $0xc0] sm:$0xff] %v437_v40 }
  0x9f   : > { %470 = vst [vmem:[#allocation4 + $0xc8] sm:$0xff] %v438_v41  ;;  %471 = vst [vmem:[#allocation4 + $0xd0] sm:$0xff] %v439_v42 }
  0xa0   : > { %472 = vst [vmem:[#allocation4 + $0xd8] sm:$0xff] %v440_v43  ;;  %473 = vst [vmem:[#allocation4 + $0xe0] sm:$0xff] %v441_v44 }
  0xa1   : > { %474 = vst [vmem:[#allocation4 + $0xe8] sm:$0xff] %v442_v45  ;;  %475 = vst [vmem:[#allocation4 + $0xf0] sm:$0xff] %v443_v46 }
  0xa2   : > { %476 = vst [vmem:[#allocation4 + $0xf8] sm:$0xff] %v444_v47 }
  0xa3 PF: > { %p477_p4 = pnand %p264_p6, %p260_p0 }
  0xa4   : > { %v2361_v48 = vld [vmem:[#allocation12] sm:$0xff] (!%p477_p4)   ;;  %s481_s27 = sshra.s32 (!%p477_p4), %s2854_s28, 3  ;;  %v2362_v49 = vld [vmem:[#allocation12 + $0x8] sm:$0xff] (!%p477_p4)   ;;  %v2363_v50 = vld [vmem:[#allocation12 + $0x10] sm:$0xff] (!%p477_p4)   ;;  %s3231_s11 = sld [smem:[#allocation19_spill]] (!%p477_p4) }
  0xa5   : > { %480 = sbr.rel (%p477_p4) target bundleno = 423 (0x1a7), region = 56  ;;  %2016 = vmatprep.subr.bf16.mxu0 (!%p477_p4), %v2361_v48  ;;  %2144 = vmatprep.subr.bf16.mxu1 (!%p477_p4), %v2361_v48  ;;  %s1866_s10 = sshll.u32 (!%p477_p4), %s481_s27, 2  ;;  %v2364_v51 = vld [vmem:[#allocation12 + $0x18] sm:$0xff] (!%p477_p4)   ;;  %v2365_v54 = vld [vmem:[#allocation12 + $0x20] sm:$0xff] (!%p477_p4)   ;;  %v2366_v55 = vld [vmem:[#allocation12 + $0x28] sm:$0xff] (!%p477_p4)  }
  0xa6   : > { %2017 = vmatpush3.bf16.msra.mxu0 (!%p477_p4), %v2361_v48  ;;  %2152 = vmatpush3.bf16.msra.mxu1 (!%p477_p4), %v2361_v48  ;;  %s2904_s13 = scalar_lea.vmem (!%p477_p4), [#allocation7], %s1866_s10  ;;  %v2367_v56 = vld [vmem:[#allocation12 + $0x30] sm:$0xff] (!%p477_p4)   ;;  %v2368_v57 = vld [vmem:[#allocation12 + $0x38] sm:$0xff] (!%p477_p4)   ;;  %s2918_s0 = scalar_lea.vmem (!%p477_p4), [#allocation13], %s2854_s28 }
  0xa7   : > { %2018 = vmatprep.subr.bf16.mxu0 (!%p477_p4), %v2362_v49  ;;  %2145 = vmatprep.subr.bf16.mxu1 (!%p477_p4), %v2362_v49  ;;  %v2369_v52 = vld [vmem:[%s2904_s13] sm:$0xff] (!%p477_p4)   ;;  %v2371_v58 = vld [vmem:[%s2904_s13 + $0x8] sm:$0xff] (!%p477_p4)   ;;  %v2373_v60 = vld [vmem:[%s2904_s13 + $0x10] sm:$0xff] (!%p477_p4)  }
  0xa8   : > { %v2370_v53 = vld [vmem:[%s2904_s13 + $0x20] sm:$0xff] (!%p477_p4)   ;;  %2032 = vmatprep.mubr.bf16.mxu0 (!%p477_p4), %v2369_v52  ;;  %v2372_v59 = vld [vmem:[%s2904_s13 + $0x28] sm:$0xff] (!%p477_p4)   ;;  %v2374_v61 = vld [vmem:[%s2904_s13 + $0x30] sm:$0xff] (!%p477_p4)  }
  0xa9   : > { %2040 = vmatprep.mubr.bf16.mxu1 (!%p477_p4), %v2370_v53  ;;  %v2375_v62 = vld [vmem:[%s2904_s13 + $0x18] sm:$0xff] (!%p477_p4)  }
  0xaa   : > { %2019 = vmatpush3.bf16.msra.mxu0 (!%p477_p4), %v2362_v49  ;;  %2153 = vmatpush3.bf16.msra.mxu1 (!%p477_p4), %v2362_v49  ;;  %v2376_v63 = vld [vmem:[%s2904_s13 + $0x38] sm:$0xff] (!%p477_p4)   ;;  %v1867_v0 = vld [vmem:[%s3231_s11] ss:$0 sm:$0xff] (!%p477_p4) }
  0xab   : > { %2020 = vmatprep.subr.bf16.mxu0 (!%p477_p4), %v2363_v50  ;;  %2146 = vmatprep.subr.bf16.mxu1 (!%p477_p4), %v2363_v50 }
  0xae   : > { %2021 = vmatpush3.bf16.msra.mxu0 %v2363_v50  ;;  %2154 = vmatpush3.bf16.msra.mxu1 %v2363_v50 }
  0xaf   : > { %2022 = vmatprep.subr.bf16.mxu0 %v2364_v51  ;;  %2147 = vmatprep.subr.bf16.mxu1 %v2364_v51 }
  0xb2   : > { %2023 = vmatpush3.bf16.msra.mxu0 %v2364_v51  ;;  %2155 = vmatpush3.bf16.msra.mxu1 %v2364_v51 }
  0xb3   : > { %2024 = vmatprep.subr.bf16.mxu0 %v2365_v54  ;;  %2148 = vmatprep.subr.bf16.mxu1 %v2365_v54 }
  0xb6   : > { %2025 = vmatpush3.bf16.msra.mxu0 %v2365_v54  ;;  %2156 = vmatpush3.bf16.msra.mxu1 %v2365_v54 }
  0xb7   : > { %2026 = vmatprep.subr.bf16.mxu0 %v2366_v55  ;;  %2149 = vmatprep.subr.bf16.mxu1 %v2366_v55 }
  0xba   : > { %2027 = vmatpush3.bf16.msra.mxu0 %v2366_v55  ;;  %2157 = vmatpush3.bf16.msra.mxu1 %v2366_v55 }
  0xbb   : > { %2028 = vmatprep.subr.bf16.mxu0 %v2367_v56  ;;  %2150 = vmatprep.subr.bf16.mxu1 %v2367_v56 }
  0xbe   : > { %2029 = vmatpush3.bf16.msra.mxu0 %v2367_v56  ;;  %2158 = vmatpush3.bf16.msra.mxu1 %v2367_v56 }
  0xbf   : > { %2030 = vmatprep.subr.bf16.mxu0 %v2368_v57  ;;  %2151 = vmatprep.subr.bf16.mxu1 %v2368_v57 }
  0xc2   : > { %2031 = vmatpush3.bf16.msra.mxu0 %v2368_v57  ;;  %2159 = vmatpush3.bf16.msra.mxu1 %v2368_v57 }
  0xc5   : > { %2033 = vmatmul.mubr.bf16.vlgmr.msra.gmra.mrb[0].mxu0 %v2371_v58  ;;  %2041 = vmatmul.mubr.bf16.vlgmr.msra.gmra.mrb[0].mxu1 %v2372_v59 }
  0xc6   : > { %2036 = vmatprep.mubr.bf16.mxu0 %v2373_v60  ;;  %2044 = vmatprep.mubr.bf16.mxu1 %v2374_v61 }
  0xcd   : > { %2037 = vmatmul.mubr.bf16.gmra.mrb[4].mxu0 %v2375_v62  ;;  %2045 = vmatmul.mubr.bf16.gmra.mrb[4].mxu1 %v2376_v63 }
 0x198   : > { %v2034_v1 = vpop.f32.mrb[0].mxu0  ;;  %v2042_v2 = vpop.f32.mrb[0].mxu1 }
 0x199   : > { %v663_v3 = vadd.f32 %v2034_v1, %v1867_v0  ;;  %v695_v4 = vadd.f32 %v2042_v2, %v1867_v0  ;;  %v654_v5 = vpop.f32.mrb[1].mxu0  ;;  %v686_v6 = vpop.f32.mrb[1].mxu1 }
 0x19a   : > { %v655_v7 = vadd.f32 %v1867_v0, %v654_v5  ;;  %v687_v8 = vadd.f32 %v1867_v0, %v686_v6  ;;  %v2035_v9 = vpop.f32.mrb[2].mxu0  ;;  %v2043_v10 = vpop.f32.mrb[2].mxu1 }
 0x19b   : > { %720 = vst [vmem:[%s2918_s0 + $0x10] sm:$0xff] %v663_v3  ;;  %728 = vst [vmem:[%s2918_s0 + $0x50] sm:$0xff] %v695_v4  ;;  %v666_v11 = vadd.f32 %v2035_v9, %v1867_v0  ;;  %v698_v12 = vadd.f32 %v2043_v10, %v1867_v0  ;;  %v657_v13 = vpop.f32.mrb[3].mxu0  ;;  %v689_v14 = vpop.f32.mrb[3].mxu1 }
 0x19c   : > { %718 = vst [vmem:[%s2918_s0] sm:$0xff] %v655_v7  ;;  %726 = vst [vmem:[%s2918_s0 + $0x40] sm:$0xff] %v687_v8  ;;  %v658_v15 = vadd.f32 %v1867_v0, %v657_v13  ;;  %v690_v16 = vadd.f32 %v1867_v0, %v689_v14 }
 0x19d   : > { %721 = vst [vmem:[%s2918_s0 + $0x18] sm:$0xff] %v666_v11  ;;  %729 = vst [vmem:[%s2918_s0 + $0x58] sm:$0xff] %v698_v12 }
 0x19e   : > { %719 = vst [vmem:[%s2918_s0 + $0x8] sm:$0xff] %v658_v15  ;;  %727 = vst [vmem:[%s2918_s0 + $0x48] sm:$0xff] %v690_v16 }
 0x1a0   : > { %v2038_v17 = vpop.f32.mrb[4].mxu0  ;;  %v2046_v18 = vpop.f32.mrb[4].mxu1 }
 0x1a1   : > { %v679_v19 = vadd.f32 %v2038_v17, %v1867_v0  ;;  %v711_v20 = vadd.f32 %v2046_v18, %v1867_v0  ;;  %v670_v21 = vpop.f32.mrb[5].mxu0  ;;  %v702_v22 = vpop.f32.mrb[5].mxu1 }
 0x1a2   : > { %v671_v23 = vadd.f32 %v1867_v0, %v670_v21  ;;  %v703_v24 = vadd.f32 %v1867_v0, %v702_v22  ;;  %v2039_v25 = vpop.f32.mrb[6].mxu0  ;;  %v2047_v26 = vpop.f32.mrb[6].mxu1 }
 0x1a3   : > { %724 = vst [vmem:[%s2918_s0 + $0x30] sm:$0xff] %v679_v19  ;;  %732 = vst [vmem:[%s2918_s0 + $0x70] sm:$0xff] %v711_v20  ;;  %v682_v27 = vadd.f32 %v2039_v25, %v1867_v0  ;;  %v714_v28 = vadd.f32 %v2047_v26, %v1867_v0  ;;  %v673_v29 = vpop.f32.mrb[7].mxu0  ;;  %v705_v30 = vpop.f32.mrb[7].mxu1 }
 0x1a4   : > { %722 = vst [vmem:[%s2918_s0 + $0x20] sm:$0xff] %v671_v23  ;;  %730 = vst [vmem:[%s2918_s0 + $0x60] sm:$0xff] %v703_v24  ;;  %v674_v31 = vadd.f32 %v1867_v0, %v673_v29  ;;  %v706_v32 = vadd.f32 %v1867_v0, %v705_v30 }
 0x1a5   : > { %725 = vst [vmem:[%s2918_s0 + $0x38] sm:$0xff] %v682_v27  ;;  %733 = vst [vmem:[%s2918_s0 + $0x78] sm:$0xff] %v714_v28 }
 0x1a6   : > { %723 = vst [vmem:[%s2918_s0 + $0x28] sm:$0xff] %v674_v31  ;;  %731 = vst [vmem:[%s2918_s0 + $0x68] sm:$0xff] %v706_v32 }
 0x1a7 PF: > { %p1884_p5 = scmp.ne.s32.totalorder %s2583_s18, 0 }
 0x1a8   : > { %v2615_v33 = vmov (!%p1884_p5), 0.0  }
 0x1a9   : > { %736 = sbr.rel (%p1884_p5) target bundleno = 433 (0x1b1), region = 60  ;;  %737 = vst [vmem:[#allocation2] sm:$0xff] (!%p1884_p5), %v2615_v33  ;;  %738 = vst [vmem:[#allocation2 + $0x8] sm:$0xff] (!%p1884_p5), %v2615_v33 }
 0x1aa   : > { %739 = vst [vmem:[#allocation2 + $0x10] sm:$0xff] (!%p1884_p5), %v2615_v33  ;;  %740 = vst [vmem:[#allocation2 + $0x18] sm:$0xff] (!%p1884_p5), %v2615_v33 }
 0x1ab   : > { %741 = vst [vmem:[#allocation2 + $0x20] sm:$0xff] (!%p1884_p5), %v2615_v33  ;;  %742 = vst [vmem:[#allocation2 + $0x28] sm:$0xff] (!%p1884_p5), %v2615_v33 }
 0x1ac   : > { %743 = vst [vmem:[#allocation2 + $0x30] sm:$0xff] (!%p1884_p5), %v2615_v33  ;;  %744 = vst [vmem:[#allocation2 + $0x38] sm:$0xff] (!%p1884_p5), %v2615_v33 }
 0x1ad   : > { %745 = vst [vmem:[#allocation2 + $0x40] sm:$0xff] (!%p1884_p5), %v2615_v33  ;;  %746 = vst [vmem:[#allocation2 + $0x48] sm:$0xff] (!%p1884_p5), %v2615_v33 }
 0x1ae   : > { %747 = vst [vmem:[#allocation2 + $0x50] sm:$0xff] (!%p1884_p5), %v2615_v33  ;;  %748 = vst [vmem:[#allocation2 + $0x58] sm:$0xff] (!%p1884_p5), %v2615_v33 }
 0x1af   : > { %749 = vst [vmem:[#allocation2 + $0x60] sm:$0xff] (!%p1884_p5), %v2615_v33  ;;  %750 = vst [vmem:[#allocation2 + $0x68] sm:$0xff] (!%p1884_p5), %v2615_v33 }
 0x1b0   : > { %751 = vst [vmem:[#allocation2 + $0x70] sm:$0xff] %v2615_v33  ;;  %752 = vst [vmem:[#allocation2 + $0x78] sm:$0xff] %v2615_v33 }
 0x1b1 PF: > { %s785_s15 = sshra.s32 %s1849_s14, 4  ;;  %v2377_v34 = vld [vmem:[%s2843_s4] sm:$0xff]   ;;  %v2379_v44 = vld [vmem:[%s2843_s4 + $0x8] sm:$0xff]   ;;  %v2381_v46 = vld [vmem:[%s2843_s4 + $0x10] sm:$0xff]   ;;  %p974_p13 = scmp.eq.s32.totalorder %s2583_s18, 1 }
 0x1b2   : > { %s1885_s30 = sshll.u32 %s785_s15, 3  ;;  %v2378_v35 = vld [vmem:[%s2843_s4 + $0x20] sm:$0xff]   ;;  %2064 = vmatprep.mubr.bf16.mxu0 %v2377_v34  ;;  %v2380_v45 = vld [vmem:[%s2843_s4 + $0x28] sm:$0xff]   ;;  %v2382_v47 = vld [vmem:[%s2843_s4 + $0x30] sm:$0xff]   ;;  %p1894_p2 = scmp.ne.s32.totalorder %s2583_s18, 1 }
 0x1b3   : > { %s2941_s6 = scalar_lea.vmem [#allocation3], %s1885_s30  ;;  %2072 = vmatprep.mubr.bf16.mxu1 %v2378_v35  ;;  %v2383_v48 = vld [vmem:[%s2843_s4 + $0x18] sm:$0xff]   ;;  %v755_v50 = vld [vmem:[#allocation2 + $0x10] sm:$0xff]  ;;  %v753_v52 = vld [vmem:[#allocation2] sm:$0xff]  ;;  %p1895_p7 = scmp.ne.s32.totalorder (!%p1894_p2), %s2591_s20, 0 }
 0x1b4   : > { %v789_v36 = vld [vmem:[%s2941_s6] sm:$0xff]  ;;  %v790_v37 = vld [vmem:[%s2941_s6 + $0x8] sm:$0xff]  ;;  %v791_v38 = vld [vmem:[%s2941_s6 + $0x10] sm:$0xff] }
 0x1b5   : > { %2048 = vmatprep.subr.bf16.mxu0 %v789_v36  ;;  %2160 = vmatprep.subr.bf16.mxu1 %v789_v36  ;;  %v792_v39 = vld [vmem:[%s2941_s6 + $0x18] sm:$0xff]  ;;  %v793_v40 = vld [vmem:[%s2941_s6 + $0x20] sm:$0xff]  ;;  %v794_v41 = vld [vmem:[%s2941_s6 + $0x28] sm:$0xff] }
 0x1b6   : > { %2049 = vmatpush3.bf16.msra.mxu0 %v789_v36  ;;  %2168 = vmatpush3.bf16.msra.mxu1 %v789_v36  ;;  %v795_v42 = vld [vmem:[%s2941_s6 + $0x30] sm:$0xff]  ;;  %v796_v43 = vld [vmem:[%s2941_s6 + $0x38] sm:$0xff]  ;;  %v761_v53 = vld [vmem:[#allocation2 + $0x40] sm:$0xff] }
 0x1b7   : > { %2050 = vmatprep.subr.bf16.mxu0 %v790_v37  ;;  %2161 = vmatprep.subr.bf16.mxu1 %v790_v37  ;;  %v2384_v49 = vld [vmem:[%s2843_s4 + $0x38] sm:$0xff]   ;;  %v763_v51 = vld [vmem:[#allocation2 + $0x50] sm:$0xff]  ;;  %v754_v62 = vld [vmem:[#allocation2 + $0x8] sm:$0xff] }
 0x1b8   : > { %v756_v56 = vld [vmem:[#allocation2 + $0x18] sm:$0xff]  ;;  %v762_v63 = vld [vmem:[#allocation2 + $0x48] sm:$0xff]  ;;  %v759_v10 = vld [vmem:[#allocation2 + $0x30] sm:$0xff] }
 0x1b9   : > { %v764_v57 = vld [vmem:[#allocation2 + $0x58] sm:$0xff]  ;;  %v767_v11 = vld [vmem:[#allocation2 + $0x70] sm:$0xff]  ;;  %v757_v12 = vld [vmem:[#allocation2 + $0x20] sm:$0xff] }
 0x1ba   : > { %2051 = vmatpush3.bf16.msra.mxu0 %v790_v37  ;;  %2169 = vmatpush3.bf16.msra.mxu1 %v790_v37  ;;  %v765_v13 = vld [vmem:[#allocation2 + $0x60] sm:$0xff]  ;;  %v760_v16 = vld [vmem:[#allocation2 + $0x38] sm:$0xff]  ;;  %v758_v22 = vld [vmem:[#allocation2 + $0x28] sm:$0xff] }
 0x1bb   : > { %2052 = vmatprep.subr.bf16.mxu0 %v791_v38  ;;  %2162 = vmatprep.subr.bf16.mxu1 %v791_v38  ;;  %v768_v17 = vld [vmem:[#allocation2 + $0x78] sm:$0xff]  ;;  %v766_v23 = vld [vmem:[#allocation2 + $0x68] sm:$0xff] }
 0x1be   : > { %2053 = vmatpush3.bf16.msra.mxu0 %v791_v38  ;;  %2170 = vmatpush3.bf16.msra.mxu1 %v791_v38 }
 0x1bf   : > { %2054 = vmatprep.subr.bf16.mxu0 %v792_v39  ;;  %2163 = vmatprep.subr.bf16.mxu1 %v792_v39 }
 0x1c2   : > { %2055 = vmatpush3.bf16.msra.mxu0 %v792_v39  ;;  %2171 = vmatpush3.bf16.msra.mxu1 %v792_v39 }
 0x1c3   : > { %2056 = vmatprep.subr.bf16.mxu0 %v793_v40  ;;  %2164 = vmatprep.subr.bf16.mxu1 %v793_v40 }
 0x1c6   : > { %2057 = vmatpush3.bf16.msra.mxu0 %v793_v40  ;;  %2172 = vmatpush3.bf16.msra.mxu1 %v793_v40 }
 0x1c7   : > { %2058 = vmatprep.subr.bf16.mxu0 %v794_v41  ;;  %2165 = vmatprep.subr.bf16.mxu1 %v794_v41 }
 0x1ca   : > { %2059 = vmatpush3.bf16.msra.mxu0 %v794_v41  ;;  %2173 = vmatpush3.bf16.msra.mxu1 %v794_v41 }
 0x1cb   : > { %2060 = vmatprep.subr.bf16.mxu0 %v795_v42  ;;  %2166 = vmatprep.subr.bf16.mxu1 %v795_v42 }
 0x1ce   : > { %2061 = vmatpush3.bf16.msra.mxu0 %v795_v42  ;;  %2174 = vmatpush3.bf16.msra.mxu1 %v795_v42 }
 0x1cf   : > { %2062 = vmatprep.subr.bf16.mxu0 %v796_v43  ;;  %2167 = vmatprep.subr.bf16.mxu1 %v796_v43 }
 0x1d2   : > { %2063 = vmatpush3.bf16.msra.mxu0 %v796_v43  ;;  %2175 = vmatpush3.bf16.msra.mxu1 %v796_v43 }
 0x1d5   : > { %2065 = vmatmul.mubr.bf16.vlgmr.msra.gmra.mrb[0].mxu0 %v2379_v44  ;;  %2073 = vmatmul.mubr.bf16.vlgmr.msra.gmra.mrb[0].mxu1 %v2380_v45 }
 0x1d6   : > { %2068 = vmatprep.mubr.bf16.mxu0 %v2381_v46  ;;  %2076 = vmatprep.mubr.bf16.mxu1 %v2382_v47 }
 0x1dd   : > { %2069 = vmatmul.mubr.bf16.gmra.mrb[4].mxu0 %v2383_v48  ;;  %2077 = vmatmul.mubr.bf16.gmra.mrb[4].mxu1 %v2384_v49 }
 0x2a8   : > { %v2066_v54 = vpop.f32.mrb[0].mxu0  ;;  %v2074_v55 = vpop.f32.mrb[0].mxu1 }
 0x2a9   : > { %v944_v58 = vadd.f32 %v2066_v54, %v755_v50  ;;  %v952_v59 = vadd.f32 %v2074_v55, %v763_v51  ;;  %v879_v60 = vpop.f32.mrb[1].mxu0  ;;  %v911_v61 = vpop.f32.mrb[1].mxu1 }
 0x2aa   : > { %v942_v0 = vadd.f32 %v879_v60, %v753_v52  ;;  %v950_v1 = vadd.f32 %v911_v61, %v761_v53  ;;  %v2067_v2 = vpop.f32.mrb[2].mxu0  ;;  %v2075_v3 = vpop.f32.mrb[2].mxu1 }
 0x2ab   : > { %960 = vst [vmem:[#allocation2 + $0x10] sm:$0xff] %v944_v58  ;;  %968 = vst [vmem:[#allocation2 + $0x50] sm:$0xff] %v952_v59  ;;  %v945_v4 = vadd.f32 %v2067_v2, %v756_v56  ;;  %v953_v5 = vadd.f32 %v2075_v3, %v764_v57  ;;  %v882_v6 = vpop.f32.mrb[3].mxu0  ;;  %v914_v7 = vpop.f32.mrb[3].mxu1 }
 0x2ac   : > { %958 = vst [vmem:[#allocation2] sm:$0xff] %v942_v0  ;;  %966 = vst [vmem:[#allocation2 + $0x40] sm:$0xff] %v950_v1  ;;  %v943_v8 = vadd.f32 %v882_v6, %v754_v62  ;;  %v951_v9 = vadd.f32 %v914_v7, %v762_v63 }
 0x2ad   : > { %961 = vst [vmem:[#allocation2 + $0x18] sm:$0xff] %v945_v4  ;;  %969 = vst [vmem:[#allocation2 + $0x58] sm:$0xff] %v953_v5 }
 0x2ae   : > { %959 = vst [vmem:[#allocation2 + $0x8] sm:$0xff] %v943_v8  ;;  %967 = vst [vmem:[#allocation2 + $0x48] sm:$0xff] %v951_v9 }
 0x2b0   : > { %v2070_v14 = vpop.f32.mrb[4].mxu0  ;;  %v2078_v15 = vpop.f32.mrb[4].mxu1  ;;  %977 = sbr.rel (%p1894_p2) target bundleno = 1219 (0x4c3), region = 64 }
 0x2b1   : > { %v948_v18 = vadd.f32 %v2070_v14, %v759_v10  ;;  %v956_v19 = vadd.f32 %v2078_v15, %v767_v11  ;;  %v895_v20 = vpop.f32.mrb[5].mxu0  ;;  %v927_v21 = vpop.f32.mrb[5].mxu1 }
 0x2b2   : > { %v946_v24 = vadd.f32 %v895_v20, %v757_v12  ;;  %v954_v25 = vadd.f32 %v927_v21, %v765_v13  ;;  %v2071_v26 = vpop.f32.mrb[6].mxu0  ;;  %v2079_v27 = vpop.f32.mrb[6].mxu1 }
 0x2b3   : > { %964 = vst [vmem:[#allocation2 + $0x30] sm:$0xff] %v948_v18  ;;  %972 = vst [vmem:[#allocation2 + $0x70] sm:$0xff] %v956_v19  ;;  %v949_v28 = vadd.f32 %v2071_v26, %v760_v16  ;;  %v957_v29 = vadd.f32 %v2079_v27, %v768_v17  ;;  %v898_v30 = vpop.f32.mrb[7].mxu0  ;;  %v930_v31 = vpop.f32.mrb[7].mxu1 }
 0x2b4   : > { %962 = vst [vmem:[#allocation2 + $0x20] sm:$0xff] %v946_v24  ;;  %970 = vst [vmem:[#allocation2 + $0x60] sm:$0xff] %v954_v25  ;;  %v947_v32 = vadd.f32 %v898_v30, %v758_v22  ;;  %v955_v33 = vadd.f32 %v930_v31, %v766_v23 }
 0x2b5   : > { %965 = vst [vmem:[#allocation2 + $0x38] sm:$0xff] %v949_v28  ;;  %973 = vst [vmem:[#allocation2 + $0x78] sm:$0xff] %v957_v29 }
 0x2b6   : > { %963 = vst [vmem:[#allocation2 + $0x28] sm:$0xff] %v947_v32  ;;  %971 = vst [vmem:[#allocation2 + $0x68] sm:$0xff] %v955_v33 }
 0x2b7   : > { %980 = sbr.rel (%p1895_p7) target bundleno = 957 (0x3bd), region = 68  ;;  %s1896_s3 = sshll.u32 (!%p1895_p7), %s2591_s20, 6  ;;  %v981_v34 = vld [vmem:[#allocation2] sm:$0xff] (!%p1895_p7)  ;;  %v982_v35 = vld [vmem:[#allocation2 + $0x8] sm:$0xff] (!%p1895_p7)  ;;  %v2967_v39 = vld [vmem:[#allocation2 + $0x10] sm:$0xff] (!%p1895_p7) }
 0x2b8   : > { %v989_v36 = vld [vmem:[#allocation2 + $0x40] sm:$0xff] (!%p1895_p7)  ;;  %s2962_s8 = scalar_lea.vmem (!%p1895_p7), [#allocation6], %s2854_s28  ;;  %v1031_v37 = vpack.c.bf16 (!%p1895_p7), %v982_v35, %v981_v34  ;;  %v990_v38 = vld [vmem:[#allocation2 + $0x48] sm:$0xff] (!%p1895_p7)  ;;  %v2969_v40 = vld [vmem:[#allocation2 + $0x18] sm:$0xff] (!%p1895_p7)  ;;  %s2971_s4 = scalar_lea.vmem (!%p1895_p7), [#allocation12], %s1896_s3 }
 0x2b9   : > { %998 = vst [vmem:[%s2962_s8] sm:$0xff] (!%p1895_p7), %v981_v34  ;;  %999 = vst [vmem:[%s2962_s8 + $0x8] sm:$0xff] (!%p1895_p7), %v982_v35  ;;  %v2385_v41 = vld [vmem:[%s2971_s4 + $0x40] sm:$0xff] (!%p1895_p7)   ;;  %v2386_v42 = vld [vmem:[%s2971_s4 + $0x48] sm:$0xff] (!%p1895_p7)   ;;  %v1035_v43 = vpack.c.bf16 (!%p1895_p7), %v990_v38, %v989_v36  ;;  %v1032_v60 = vpack.c.bf16 (!%p1895_p7), %v2969_v40, %v2967_v39  ;;  %s2999_s14 = scalar_lea.vmem (!%p1895_p7), [#allocation13], %s2854_s28 }
 0x2ba   : > { %1006 = vst [vmem:[%s2962_s8 + $0x40] sm:$0xff] (!%p1895_p7), %v989_v36  ;;  %1007 = vst [vmem:[%s2962_s8 + $0x48] sm:$0xff] (!%p1895_p7), %v990_v38  ;;  %2096 = vmatprep.mubr.bf16.mxu0 (!%p1895_p7), %v1031_v37  ;;  %2080 = vmatprep.subr.bf16.mxu0 (!%p1895_p7), %v2385_v41  ;;  %v2387_v44 = vld [vmem:[%s2971_s4 + $0x50] sm:$0xff] (!%p1895_p7)   ;;  %v2388_v45 = vld [vmem:[%s2971_s4 + $0x58] sm:$0xff] (!%p1895_p7)  }
 0x2bb   : > { %1000 = vst [vmem:[%s2962_s8 + $0x10] sm:$0xff] (!%p1895_p7), %v2967_v39  ;;  %1001 = vst [vmem:[%s2962_s8 + $0x18] sm:$0xff] (!%p1895_p7), %v2969_v40  ;;  %2176 = vmatprep.subr.bf16.mxu1 (!%p1895_p7), %v2385_v41  ;;  %2081 = vmatpush3.bf16.msra.mxu0 (!%p1895_p7), %v2385_v41  ;;  %v991_v46 = vld [vmem:[#allocation2 + $0x50] sm:$0xff] (!%p1895_p7)  ;;  %v992_v47 = vld [vmem:[#allocation2 + $0x58] sm:$0xff] (!%p1895_p7) }
 0x2bc   : > { %2184 = vmatpush3.bf16.msra.mxu1 (!%p1895_p7), %v2385_v41  ;;  %2082 = vmatprep.subr.bf16.mxu0 (!%p1895_p7), %v2386_v42  ;;  %v985_v48 = vld [vmem:[#allocation2 + $0x20] sm:$0xff] (!%p1895_p7)  ;;  %1008 = vst [vmem:[%s2962_s8 + $0x50] sm:$0xff] (!%p1895_p7), %v991_v46  ;;  %1009 = vst [vmem:[%s2962_s8 + $0x58] sm:$0xff] (!%p1895_p7), %v992_v47  ;;  %v987_v52 = vld [vmem:[#allocation2 + $0x30] sm:$0xff] (!%p1895_p7)  ;;  %v1036_v61 = vpack.c.bf16 (!%p1895_p7), %v992_v47, %v991_v46 }
 0x2bd   : > { %2177 = vmatprep.subr.bf16.mxu1 (!%p1895_p7), %v2386_v42  ;;  %2104 = vmatprep.mubr.bf16.mxu1 (!%p1895_p7), %v1035_v43  ;;  %v986_v49 = vld [vmem:[#allocation2 + $0x28] sm:$0xff] (!%p1895_p7)  ;;  %1002 = vst [vmem:[%s2962_s8 + $0x20] sm:$0xff] (!%p1895_p7), %v985_v48  ;;  %v993_v50 = vld [vmem:[#allocation2 + $0x60] sm:$0xff] (!%p1895_p7)  ;;  %v988_v53 = vld [vmem:[#allocation2 + $0x38] sm:$0xff] (!%p1895_p7) }
 0x2be   : > { %v994_v51 = vld [vmem:[#allocation2 + $0x68] sm:$0xff]  ;;  %1003 = vst [vmem:[%s2962_s8 + $0x28] sm:$0xff] %v986_v49  ;;  %1010 = vst [vmem:[%s2962_s8 + $0x60] sm:$0xff] %v993_v50  ;;  %v995_v54 = vld [vmem:[#allocation2 + $0x70] sm:$0xff]  ;;  %v1033_v62 = vpack.c.bf16 %v986_v49, %v985_v48  ;;  %v1034_v0 = vpack.c.bf16 %v988_v53, %v987_v52 }
 0x2bf   : > { %2083 = vmatpush3.bf16.msra.mxu0 %v2386_v42  ;;  %1011 = vst [vmem:[%s2962_s8 + $0x68] sm:$0xff] %v994_v51  ;;  %1004 = vst [vmem:[%s2962_s8 + $0x30] sm:$0xff] %v987_v52  ;;  %v996_v55 = vld [vmem:[#allocation2 + $0x78] sm:$0xff]  ;;  %v2389_v56 = vld [vmem:[%s2971_s4 + $0x60] sm:$0xff]   ;;  %v1037_v63 = vpack.c.bf16 %v994_v51, %v993_v50 }
 0x2c0   : > { %2185 = vmatpush3.bf16.msra.mxu1 %v2386_v42  ;;  %2084 = vmatprep.subr.bf16.mxu0 %v2387_v44  ;;  %1005 = vst [vmem:[%s2962_s8 + $0x38] sm:$0xff] %v988_v53  ;;  %1012 = vst [vmem:[%s2962_s8 + $0x70] sm:$0xff] %v995_v54  ;;  %v2390_v57 = vld [vmem:[%s2971_s4 + $0x68] sm:$0xff]   ;;  %v2391_v58 = vld [vmem:[%s2971_s4 + $0x70] sm:$0xff]   ;;  %v1038_v1 = vpack.c.bf16 %v996_v55, %v995_v54 }
 0x2c1   : > { %2178 = vmatprep.subr.bf16.mxu1 %v2387_v44  ;;  %1013 = vst [vmem:[%s2962_s8 + $0x78] sm:$0xff] %v996_v55  ;;  %v2392_v59 = vld [vmem:[%s2971_s4 + $0x78] sm:$0xff]   ;;  %v1017_v2 = vld [vmem:[%s2999_s14 + $0x10] sm:$0xff]  ;;  %v1015_v4 = vld [vmem:[%s2999_s14] sm:$0xff] }
 0x2c2   : > { %v1025_v3 = vld [vmem:[%s2999_s14 + $0x50] sm:$0xff]  ;;  %v1023_v5 = vld [vmem:[%s2999_s14 + $0x40] sm:$0xff]  ;;  %v1018_v8 = vld [vmem:[%s2999_s14 + $0x18] sm:$0xff] }
 0x2c3   : > { %2085 = vmatpush3.bf16.msra.mxu0 %v2387_v44  ;;  %v1026_v9 = vld [vmem:[%s2999_s14 + $0x58] sm:$0xff]  ;;  %v1016_v14 = vld [vmem:[%s2999_s14 + $0x8] sm:$0xff]  ;;  %v1021_v26 = vld [vmem:[%s2999_s14 + $0x30] sm:$0xff] }
 0x2c4   : > { %2186 = vmatpush3.bf16.msra.mxu1 %v2387_v44  ;;  %2086 = vmatprep.subr.bf16.mxu0 %v2388_v45  ;;  %v1024_v15 = vld [vmem:[%s2999_s14 + $0x48] sm:$0xff]  ;;  %v1029_v27 = vld [vmem:[%s2999_s14 + $0x70] sm:$0xff]  ;;  %v1019_v28 = vld [vmem:[%s2999_s14 + $0x20] sm:$0xff] }
 0x2c5   : > { %2179 = vmatprep.subr.bf16.mxu1 %v2388_v45  ;;  %v1027_v29 = vld [vmem:[%s2999_s14 + $0x60] sm:$0xff]  ;;  %v1022_v32 = vld [vmem:[%s2999_s14 + $0x38] sm:$0xff]  ;;  %v1020_v38 = vld [vmem:[%s2999_s14 + $0x28] sm:$0xff] }
 0x2c6   : > { %v1030_v33 = vld [vmem:[%s2999_s14 + $0x78] sm:$0xff]  ;;  %v1028_v39 = vld [vmem:[%s2999_s14 + $0x68] sm:$0xff] }
 0x2c7   : > { %2087 = vmatpush3.bf16.msra.mxu0 %v2388_v45 }
 0x2c8   : > { %2187 = vmatpush3.bf16.msra.mxu1 %v2388_v45  ;;  %2088 = vmatprep.subr.bf16.mxu0 %v2389_v56 }
 0x2c9   : > { %2180 = vmatprep.subr.bf16.mxu1 %v2389_v56 }
 0x2cb   : > { %2089 = vmatpush3.bf16.msra.mxu0 %v2389_v56 }
 0x2cc   : > { %2188 = vmatpush3.bf16.msra.mxu1 %v2389_v56  ;;  %2090 = vmatprep.subr.bf16.mxu0 %v2390_v57 }
 0x2cd   : > { %2181 = vmatprep.subr.bf16.mxu1 %v2390_v57 }
 0x2cf   : > { %2091 = vmatpush3.bf16.msra.mxu0 %v2390_v57 }
 0x2d0   : > { %2189 = vmatpush3.bf16.msra.mxu1 %v2390_v57  ;;  %2092 = vmatprep.subr.bf16.mxu0 %v2391_v58 }
 0x2d1   : > { %2182 = vmatprep.subr.bf16.mxu1 %v2391_v58 }
 0x2d3   : > { %2093 = vmatpush3.bf16.msra.mxu0 %v2391_v58 }
 0x2d4   : > { %2190 = vmatpush3.bf16.msra.mxu1 %v2391_v58  ;;  %2094 = vmatprep.subr.bf16.mxu0 %v2392_v59 }
 0x2d5   : > { %2183 = vmatprep.subr.bf16.mxu1 %v2392_v59 }
 0x2d7   : > { %2095 = vmatpush3.bf16.msra.mxu0 %v2392_v59 }
 0x2d8   : > { %2191 = vmatpush3.bf16.msra.mxu1 %v2392_v59 }
 0x2da   : > { %2097 = vmatmul.mubr.bf16.vlgmr.msra.gmra.mrb[0].mxu0 %v1032_v60 }
 0x2db   : > { %2105 = vmatmul.mubr.bf16.vlgmr.msra.gmra.mrb[0].mxu1 %v1036_v61  ;;  %2100 = vmatprep.mubr.bf16.mxu0 %v1033_v62 }
 0x2dc   : > { %2108 = vmatprep.mubr.bf16.mxu1 %v1037_v63 }
 0x2e2   : > { %2101 = vmatmul.mubr.bf16.gmra.mrb[4].mxu0 %v1034_v0 }
 0x2e3   : > { %2109 = vmatmul.mubr.bf16.gmra.mrb[4].mxu1 %v1038_v1 }
 0x3ad   : > { %v2098_v6 = vpop.f32.mrb[0].mxu0 }
 0x3ae   : > { %v2106_v7 = vpop.f32.mrb[0].mxu1  ;;  %v1206_v10 = vadd.f32 %v2098_v6, %v1017_v2  ;;  %v1141_v12 = vpop.f32.mrb[1].mxu0 }
 0x3af   : > { %v1214_v11 = vadd.f32 %v2106_v7, %v1025_v3  ;;  %v1173_v13 = vpop.f32.mrb[1].mxu1  ;;  %v1204_v16 = vadd.f32 %v1141_v12, %v1015_v4  ;;  %v2099_v18 = vpop.f32.mrb[2].mxu0 }
 0x3b0   : > { %v1212_v17 = vadd.f32 %v1173_v13, %v1023_v5  ;;  %v2107_v19 = vpop.f32.mrb[2].mxu1  ;;  %1222 = vst [vmem:[%s2999_s14 + $0x10] sm:$0xff] %v1206_v10  ;;  %v1207_v20 = vadd.f32 %v2099_v18, %v1018_v8  ;;  %v1144_v22 = vpop.f32.mrb[3].mxu0 }
 0x3b1   : > { %1230 = vst [vmem:[%s2999_s14 + $0x50] sm:$0xff] %v1214_v11  ;;  %v1215_v21 = vadd.f32 %v2107_v19, %v1026_v9  ;;  %v1176_v23 = vpop.f32.mrb[3].mxu1  ;;  %1220 = vst [vmem:[%s2999_s14] sm:$0xff] %v1204_v16  ;;  %v1205_v24 = vadd.f32 %v1144_v22, %v1016_v14 }
 0x3b2   : > { %1228 = vst [vmem:[%s2999_s14 + $0x40] sm:$0xff] %v1212_v17  ;;  %v1213_v25 = vadd.f32 %v1176_v23, %v1024_v15  ;;  %1223 = vst [vmem:[%s2999_s14 + $0x18] sm:$0xff] %v1207_v20 }
 0x3b3   : > { %1231 = vst [vmem:[%s2999_s14 + $0x58] sm:$0xff] %v1215_v21  ;;  %1221 = vst [vmem:[%s2999_s14 + $0x8] sm:$0xff] %v1205_v24 }
 0x3b4   : > { %1229 = vst [vmem:[%s2999_s14 + $0x48] sm:$0xff] %v1213_v25 }
 0x3b5   : > { %v2102_v30 = vpop.f32.mrb[4].mxu0 }
 0x3b6   : > { %v2110_v31 = vpop.f32.mrb[4].mxu1  ;;  %v1210_v34 = vadd.f32 %v2102_v30, %v1021_v26  ;;  %v1157_v36 = vpop.f32.mrb[5].mxu0 }
 0x3b7   : > { %v1218_v35 = vadd.f32 %v2110_v31, %v1029_v27  ;;  %v1189_v37 = vpop.f32.mrb[5].mxu1  ;;  %v1208_v40 = vadd.f32 %v1157_v36, %v1019_v28  ;;  %v2103_v42 = vpop.f32.mrb[6].mxu0 }
 0x3b8   : > { %v1216_v41 = vadd.f32 %v1189_v37, %v1027_v29  ;;  %v2111_v43 = vpop.f32.mrb[6].mxu1  ;;  %1226 = vst [vmem:[%s2999_s14 + $0x30] sm:$0xff] %v1210_v34  ;;  %v1211_v44 = vadd.f32 %v2103_v42, %v1022_v32  ;;  %v1160_v46 = vpop.f32.mrb[7].mxu0 }
 0x3b9   : > { %1234 = vst [vmem:[%s2999_s14 + $0x70] sm:$0xff] %v1218_v35  ;;  %v1219_v45 = vadd.f32 %v2111_v43, %v1030_v33  ;;  %v1192_v47 = vpop.f32.mrb[7].mxu1  ;;  %1224 = vst [vmem:[%s2999_s14 + $0x20] sm:$0xff] %v1208_v40  ;;  %v1209_v48 = vadd.f32 %v1160_v46, %v1020_v38 }
 0x3ba   : > { %1232 = vst [vmem:[%s2999_s14 + $0x60] sm:$0xff] %v1216_v41  ;;  %v1217_v49 = vadd.f32 %v1192_v47, %v1028_v39  ;;  %1227 = vst [vmem:[%s2999_s14 + $0x38] sm:$0xff] %v1211_v44 }
 0x3bb   : > { %1235 = vst [vmem:[%s2999_s14 + $0x78] sm:$0xff] %v1219_v45  ;;  %1225 = vst [vmem:[%s2999_s14 + $0x28] sm:$0xff] %v1209_v48 }
 0x3bc   : > { %1233 = vst [vmem:[%s2999_s14 + $0x68] sm:$0xff] %v1217_v49 }
 0x3bd PF: > { %p1921_p9 = scmp.le.s32.totalorder %s2591_s20, 0 }
 0x3be   : > { %s1922_s27 = sshll.u32 (!%p1921_p9), %s2591_s20, 6  ;;  %v1240_v50 = vld [vmem:[#allocation2] sm:$0xff] (!%p1921_p9)  ;;  %v1241_v51 = vld [vmem:[#allocation2 + $0x8] sm:$0xff] (!%p1921_p9)  ;;  %s3036_s10 = scalar_lea.vmem (!%p1921_p9), [#allocation5], %s2854_s28  ;;  %v1242_v6 = vld [vmem:[#allocation2 + $0x10] sm:$0xff] (!%p1921_p9) }
 0x3bf   : > { %1239 = sbr.rel (%p1921_p9) target bundleno = 1219 (0x4c3), region = 72  ;;  %v1256_v52 = vmul.f32 (!%p1921_p9), 2.0, %v1240_v50  ;;  %v1257_v53 = vmul.f32 (!%p1921_p9), 2.0, %v1241_v51  ;;  %v1273_v54 = vld [vmem:[%s3036_s10] sm:$0xff] (!%p1921_p9)  ;;  %v1274_v55 = vld [vmem:[%s3036_s10 + $0x8] sm:$0xff] (!%p1921_p9)  ;;  %s3040_s13 = scalar_lea.vmem (!%p1921_p9), [#allocation12], %s1922_s27 }
 0x3c0   : > { %v2393_v56 = vld [vmem:[%s3040_s13 + $0x40] sm:$0xff] (!%p1921_p9)   ;;  %v2394_v57 = vld [vmem:[%s3040_s13 + $0x48] sm:$0xff] (!%p1921_p9)   ;;  %s3045_s12 = scalar_lea.vmem (!%p1921_p9), [#allocation6], %s2854_s28  ;;  %v2395_v62 = vld [vmem:[%s3040_s13 + $0x50] sm:$0xff] (!%p1921_p9)   ;;  %v1258_v10 = vmul.f32 (!%p1921_p9), 2.0, %v1242_v6  ;;  %s3110_s29 = scalar_lea.vmem (!%p1921_p9), [#allocation13], %s2854_s28 }
 0x3c1   : > { %v1289_v58 = vsub.f32 (!%p1921_p9), %v1256_v52, %v1273_v54  ;;  %v1290_v59 = vsub.f32 (!%p1921_p9), %v1257_v53, %v1274_v55  ;;  %2112 = vmatprep.subr.bf16.mxu0 (!%p1921_p9), %v2393_v56  ;;  %2192 = vmatprep.subr.bf16.mxu1 (!%p1921_p9), %v2393_v56  ;;  %v1248_v60 = vld [vmem:[#allocation2 + $0x40] sm:$0xff] (!%p1921_p9)  ;;  %v2396_v0 = vld [vmem:[%s3040_s13 + $0x58] sm:$0xff] (!%p1921_p9)   ;;  %v1249_v1 = vld [vmem:[#allocation2 + $0x48] sm:$0xff] (!%p1921_p9) }
 0x3c2   : > { %2113 = vmatpush3.bf16.msra.mxu0 (!%p1921_p9), %v2393_v56  ;;  %2200 = vmatpush3.bf16.msra.mxu1 (!%p1921_p9), %v2393_v56  ;;  %v1264_v63 = vmul.f32 (!%p1921_p9), 2.0, %v1248_v60  ;;  %v1281_v2 = vld [vmem:[%s3036_s10 + $0x40] sm:$0xff] (!%p1921_p9)  ;;  %v1282_v3 = vld [vmem:[%s3036_s10 + $0x48] sm:$0xff] (!%p1921_p9)  ;;  %v1265_v4 = vmul.f32 (!%p1921_p9), 2.0, %v1249_v1  ;;  %v1243_v7 = vld [vmem:[#allocation2 + $0x18] sm:$0xff] (!%p1921_p9) }
 0x3c3   : > { %1306 = vst [vmem:[%s3045_s12] sm:$0xff] (!%p1921_p9), %v1289_v58  ;;  %1307 = vst [vmem:[%s3045_s12 + $0x8] sm:$0xff] (!%p1921_p9), %v1290_v59  ;;  %v1339_v61 = vpack.c.bf16 (!%p1921_p9), %v1290_v59, %v1289_v58  ;;  %2114 = vmatprep.subr.bf16.mxu0 (!%p1921_p9), %v2394_v57  ;;  %2193 = vmatprep.subr.bf16.mxu1 (!%p1921_p9), %v2394_v57  ;;  %v1275_v8 = vld [vmem:[%s3036_s10 + $0x10] sm:$0xff] (!%p1921_p9)  ;;  %v3057_v9 = vld [vmem:[%s3040_s13 + $0x60] sm:$0xff] (!%p1921_p9)   ;;  %v1259_v11 = vmul.f32 (!%p1921_p9), 2.0, %v1243_v7 }
 0x3c4   : > { %v3053_v5 = vsub.f32 (!%p1921_p9), %v1264_v63, %v1281_v2  ;;  %v1276_v12 = vld [vmem:[%s3036_s10 + $0x18] sm:$0xff] (!%p1921_p9)  ;;  %v1250_v13 = vld [vmem:[#allocation2 + $0x50] sm:$0xff] (!%p1921_p9)  ;;  %v1298_v15 = vsub.f32 (!%p1921_p9), %v1265_v4, %v1282_v3  ;;  %v1244_v20 = vld [vmem:[#allocation2 + $0x20] sm:$0xff] (!%p1921_p9)  ;;  %v3064_v21 = vsub.f32 (!%p1921_p9), %v1258_v10, %v1275_v8 }
 0x3c5   : > { %2128 = vmatprep.mubr.bf16.mxu0 (!%p1921_p9), %v1339_v61  ;;  %v1251_v14 = vld [vmem:[#allocation2 + $0x58] sm:$0xff] (!%p1921_p9)  ;;  %v1266_v16 = vmul.f32 (!%p1921_p9), 2.0, %v1250_v13  ;;  %v1283_v18 = vld [vmem:[%s3036_s10 + $0x50] sm:$0xff] (!%p1921_p9)  ;;  %v3066_v22 = vsub.f32 (!%p1921_p9), %v1259_v11, %v1276_v12  ;;  %v1245_v23 = vld [vmem:[#allocation2 + $0x28] sm:$0xff] (!%p1921_p9)  ;;  %v1260_v24 = vmul.f32 (!%p1921_p9), 2.0, %v1244_v20 }
 0x3c6   : > { %2115 = vmatpush3.bf16.msra.mxu0 %v2394_v57  ;;  %2201 = vmatpush3.bf16.msra.mxu1 %v2394_v57  ;;  %1314 = vst [vmem:[%s3045_s12 + $0x40] sm:$0xff] %v3053_v5  ;;  %v1267_v17 = vmul.f32 2.0, %v1251_v14  ;;  %v1284_v19 = vld [vmem:[%s3036_s10 + $0x58] sm:$0xff]  ;;  %v1277_v25 = vld [vmem:[%s3036_s10 + $0x20] sm:$0xff]  ;;  %v1278_v26 = vld [vmem:[%s3036_s10 + $0x28] sm:$0xff]  ;;  %v1343_v27 = vpack.c.bf16 %v1298_v15, %v3053_v5  ;;  %v1261_v30 = vmul.f32 2.0, %v1245_v23 }
 0x3c7   : > { %2116 = vmatprep.subr.bf16.mxu0 %v2395_v62  ;;  %2194 = vmatprep.subr.bf16.mxu1 %v2395_v62  ;;  %1315 = vst [vmem:[%s3045_s12 + $0x48] sm:$0xff] %v1298_v15  ;;  %v3072_v28 = vsub.f32 %v1266_v16, %v1283_v18  ;;  %v1252_v31 = vld [vmem:[#allocation2 + $0x60] sm:$0xff]  ;;  %v1253_v32 = vld [vmem:[#allocation2 + $0x68] sm:$0xff]  ;;  %1308 = vst [vmem:[%s3045_s12 + $0x10] sm:$0xff] %v3064_v21  ;;  %v1293_v35 = vsub.f32 %v1260_v24, %v1277_v25 }
 0x3c8   : > { %v3074_v29 = vsub.f32 %v1267_v17, %v1284_v19  ;;  %v1285_v33 = vld [vmem:[%s3036_s10 + $0x60] sm:$0xff]  ;;  %v2398_v34 = vld [vmem:[%s3040_s13 + $0x68] sm:$0xff]   ;;  %1309 = vst [vmem:[%s3045_s12 + $0x18] sm:$0xff] %v3066_v22  ;;  %v1268_v36 = vmul.f32 2.0, %v1252_v31  ;;  %v1269_v37 = vmul.f32 2.0, %v1253_v32  ;;  %v1246_v39 = vld [vmem:[#allocation2 + $0x30] sm:$0xff]  ;;  %v1294_v41 = vsub.f32 %v1261_v30, %v1278_v26  ;;  %2136 = vmatprep.mubr.bf16.mxu1 %v1343_v27 }
 0x3c9   : > { %v1286_v38 = vld [vmem:[%s3036_s10 + $0x68] sm:$0xff]  ;;  %v1247_v40 = vld [vmem:[#allocation2 + $0x38] sm:$0xff]  ;;  %1316 = vst [vmem:[%s3045_s12 + $0x50] sm:$0xff] %v3072_v28  ;;  %v1262_v42 = vmul.f32 2.0, %v1246_v39  ;;  %v1279_v44 = vld [vmem:[%s3036_s10 + $0x30] sm:$0xff]  ;;  %v1340_v60 = vpack.c.bf16 %v3066_v22, %v3064_v21 }
 0x3ca   : > { %2117 = vmatpush3.bf16.msra.mxu0 %v2395_v62  ;;  %2202 = vmatpush3.bf16.msra.mxu1 %v2395_v62  ;;  %1317 = vst [vmem:[%s3045_s12 + $0x58] sm:$0xff] %v3074_v29  ;;  %v1263_v43 = vmul.f32 2.0, %v1247_v40  ;;  %v1280_v45 = vld [vmem:[%s3036_s10 + $0x38] sm:$0xff]  ;;  %v1254_v46 = vld [vmem:[#allocation2 + $0x70] sm:$0xff]  ;;  %1310 = vst [vmem:[%s3045_s12 + $0x20] sm:$0xff] %v1293_v35  ;;  %v1301_v47 = vsub.f32 %v1268_v36, %v1285_v33  ;;  %v1302_v48 = vsub.f32 %v1269_v37, %v1286_v38 }
 0x3cb   : > { %2118 = vmatprep.subr.bf16.mxu0 %v2396_v0  ;;  %2195 = vmatprep.subr.bf16.mxu1 %v2396_v0  ;;  %v1255_v49 = vld [vmem:[#allocation2 + $0x78] sm:$0xff]  ;;  %v1270_v50 = vmul.f32 2.0, %v1254_v46  ;;  %v1287_v51 = vld [vmem:[%s3036_s10 + $0x70] sm:$0xff]  ;;  %1311 = vst [vmem:[%s3045_s12 + $0x28] sm:$0xff] %v1294_v41  ;;  %v1295_v53 = vsub.f32 %v1262_v42, %v1279_v44  ;;  %v1344_v61 = vpack.c.bf16 %v3074_v29, %v3072_v28  ;;  %v1323_v4 = vld [vmem:[%s3110_s29] sm:$0xff] }
 0x3cc   : > { %v1288_v52 = vld [vmem:[%s3036_s10 + $0x78] sm:$0xff]  ;;  %v1296_v54 = vsub.f32 %v1263_v43, %v1280_v45  ;;  %v1271_v55 = vmul.f32 2.0, %v1255_v49  ;;  %1318 = vst [vmem:[%s3045_s12 + $0x60] sm:$0xff] %v1301_v47  ;;  %1319 = vst [vmem:[%s3045_s12 + $0x68] sm:$0xff] %v1302_v48  ;;  %v2399_v58 = vld [vmem:[%s3040_s13 + $0x70] sm:$0xff]   ;;  %v1341_v62 = vpack.c.bf16 %v1294_v41, %v1293_v35  ;;  %v1345_v63 = vpack.c.bf16 %v1302_v48, %v1301_v47 }
 0x3cd   : > { %v1303_v56 = vsub.f32 %v1270_v50, %v1287_v51  ;;  %1312 = vst [vmem:[%s3045_s12 + $0x30] sm:$0xff] %v1295_v53  ;;  %v2400_v59 = vld [vmem:[%s3040_s13 + $0x78] sm:$0xff]   ;;  %v1325_v2 = vld [vmem:[%s3110_s29 + $0x10] sm:$0xff]  ;;  %v1331_v5 = vld [vmem:[%s3110_s29 + $0x40] sm:$0xff] }
 0x3ce   : > { %2119 = vmatpush3.bf16.msra.mxu0 %v2396_v0  ;;  %2203 = vmatpush3.bf16.msra.mxu1 %v2396_v0  ;;  %1313 = vst [vmem:[%s3045_s12 + $0x38] sm:$0xff] %v1296_v54  ;;  %v1304_v57 = vsub.f32 %v1271_v55, %v1288_v52  ;;  %v1342_v0 = vpack.c.bf16 %v1296_v54, %v1295_v53  ;;  %v1333_v3 = vld [vmem:[%s3110_s29 + $0x50] sm:$0xff]  ;;  %v1326_v8 = vld [vmem:[%s3110_s29 + $0x18] sm:$0xff]  ;;  %v1324_v14 = vld [vmem:[%s3110_s29 + $0x8] sm:$0xff] }
 0x3cf   : > { %2120 = vmatprep.subr.bf16.mxu0 %v3057_v9  ;;  %2196 = vmatprep.subr.bf16.mxu1 %v3057_v9  ;;  %1320 = vst [vmem:[%s3045_s12 + $0x70] sm:$0xff] %v1303_v56  ;;  %v1332_v15 = vld [vmem:[%s3110_s29 + $0x48] sm:$0xff]  ;;  %v1329_v26 = vld [vmem:[%s3110_s29 + $0x30] sm:$0xff]  ;;  %v1327_v28 = vld [vmem:[%s3110_s29 + $0x20] sm:$0xff] }
 0x3d0   : > { %1321 = vst [vmem:[%s3045_s12 + $0x78] sm:$0xff] %v1304_v57  ;;  %v1346_v1 = vpack.c.bf16 %v1304_v57, %v1303_v56  ;;  %v1337_v27 = vld [vmem:[%s3110_s29 + $0x70] sm:$0xff]  ;;  %v1335_v29 = vld [vmem:[%s3110_s29 + $0x60] sm:$0xff]  ;;  %v1330_v32 = vld [vmem:[%s3110_s29 + $0x38] sm:$0xff] }
 0x3d1   : > { %v1338_v33 = vld [vmem:[%s3110_s29 + $0x78] sm:$0xff]  ;;  %v1328_v38 = vld [vmem:[%s3110_s29 + $0x28] sm:$0xff] }
 0x3d2   : > { %2121 = vmatpush3.bf16.msra.mxu0 %v3057_v9  ;;  %2204 = vmatpush3.bf16.msra.mxu1 %v3057_v9  ;;  %v1334_v9 = vld [vmem:[%s3110_s29 + $0x58] sm:$0xff]  ;;  %v1336_v39 = vld [vmem:[%s3110_s29 + $0x68] sm:$0xff] }
 0x3d3   : > { %2122 = vmatprep.subr.bf16.mxu0 %v2398_v34  ;;  %2197 = vmatprep.subr.bf16.mxu1 %v2398_v34 }
 0x3d6   : > { %2123 = vmatpush3.bf16.msra.mxu0 %v2398_v34  ;;  %2205 = vmatpush3.bf16.msra.mxu1 %v2398_v34 }
 0x3d7   : > { %2124 = vmatprep.subr.bf16.mxu0 %v2399_v58  ;;  %2198 = vmatprep.subr.bf16.mxu1 %v2399_v58 }
 0x3da   : > { %2125 = vmatpush3.bf16.msra.mxu0 %v2399_v58  ;;  %2206 = vmatpush3.bf16.msra.mxu1 %v2399_v58 }
 0x3db   : > { %2126 = vmatprep.subr.bf16.mxu0 %v2400_v59  ;;  %2199 = vmatprep.subr.bf16.mxu1 %v2400_v59 }
 0x3de   : > { %2127 = vmatpush3.bf16.msra.mxu0 %v2400_v59  ;;  %2207 = vmatpush3.bf16.msra.mxu1 %v2400_v59 }
 0x3e1   : > { %2129 = vmatmul.mubr.bf16.vlgmr.msra.gmra.mrb[0].mxu0 %v1340_v60  ;;  %2137 = vmatmul.mubr.bf16.vlgmr.msra.gmra.mrb[0].mxu1 %v1344_v61 }
 0x3e2   : > { %2132 = vmatprep.mubr.bf16.mxu0 %v1341_v62  ;;  %2140 = vmatprep.mubr.bf16.mxu1 %v1345_v63 }
 0x3e9   : > { %2133 = vmatmul.mubr.bf16.gmra.mrb[4].mxu0 %v1342_v0  ;;  %2141 = vmatmul.mubr.bf16.gmra.mrb[4].mxu1 %v1346_v1 }
 0x4b4   : > { %v2130_v6 = vpop.f32.mrb[0].mxu0  ;;  %v2138_v7 = vpop.f32.mrb[0].mxu1 }
 0x4b5   : > { %v1514_v10 = vadd.f32 %v2130_v6, %v1325_v2  ;;  %v1522_v11 = vadd.f32 %v2138_v7, %v1333_v3  ;;  %v1449_v12 = vpop.f32.mrb[1].mxu0  ;;  %v1481_v13 = vpop.f32.mrb[1].mxu1 }
 0x4b6   : > { %v1512_v16 = vadd.f32 %v1449_v12, %v1323_v4  ;;  %v1520_v17 = vadd.f32 %v1481_v13, %v1331_v5  ;;  %v2131_v18 = vpop.f32.mrb[2].mxu0  ;;  %v2139_v19 = vpop.f32.mrb[2].mxu1 }
 0x4b7   : > { %1530 = vst [vmem:[%s3110_s29 + $0x10] sm:$0xff] %v1514_v10  ;;  %1538 = vst [vmem:[%s3110_s29 + $0x50] sm:$0xff] %v1522_v11  ;;  %v1515_v20 = vadd.f32 %v2131_v18, %v1326_v8  ;;  %v1523_v21 = vadd.f32 %v2139_v19, %v1334_v9  ;;  %v1452_v22 = vpop.f32.mrb[3].mxu0  ;;  %v1484_v23 = vpop.f32.mrb[3].mxu1 }
 0x4b8   : > { %1528 = vst [vmem:[%s3110_s29] sm:$0xff] %v1512_v16  ;;  %1536 = vst [vmem:[%s3110_s29 + $0x40] sm:$0xff] %v1520_v17  ;;  %v1513_v24 = vadd.f32 %v1452_v22, %v1324_v14  ;;  %v1521_v25 = vadd.f32 %v1484_v23, %v1332_v15 }
 0x4b9   : > { %1531 = vst [vmem:[%s3110_s29 + $0x18] sm:$0xff] %v1515_v20  ;;  %1539 = vst [vmem:[%s3110_s29 + $0x58] sm:$0xff] %v1523_v21 }
 0x4ba   : > { %1529 = vst [vmem:[%s3110_s29 + $0x8] sm:$0xff] %v1513_v24  ;;  %1537 = vst [vmem:[%s3110_s29 + $0x48] sm:$0xff] %v1521_v25 }
 0x4bc   : > { %v2134_v30 = vpop.f32.mrb[4].mxu0  ;;  %v2142_v31 = vpop.f32.mrb[4].mxu1 }
 0x4bd   : > { %v1518_v34 = vadd.f32 %v2134_v30, %v1329_v26  ;;  %v1526_v35 = vadd.f32 %v2142_v31, %v1337_v27  ;;  %v1465_v36 = vpop.f32.mrb[5].mxu0  ;;  %v1497_v37 = vpop.f32.mrb[5].mxu1 }
 0x4be   : > { %v1516_v40 = vadd.f32 %v1465_v36, %v1327_v28  ;;  %v1524_v41 = vadd.f32 %v1497_v37, %v1335_v29  ;;  %v2135_v42 = vpop.f32.mrb[6].mxu0  ;;  %v2143_v43 = vpop.f32.mrb[6].mxu1 }
 0x4bf   : > { %1534 = vst [vmem:[%s3110_s29 + $0x30] sm:$0xff] %v1518_v34  ;;  %1542 = vst [vmem:[%s3110_s29 + $0x70] sm:$0xff] %v1526_v35  ;;  %v1519_v44 = vadd.f32 %v2135_v42, %v1330_v32  ;;  %v1527_v45 = vadd.f32 %v2143_v43, %v1338_v33  ;;  %v1468_v46 = vpop.f32.mrb[7].mxu0  ;;  %v1500_v47 = vpop.f32.mrb[7].mxu1 }
 0x4c0   : > { %1532 = vst [vmem:[%s3110_s29 + $0x20] sm:$0xff] %v1516_v40  ;;  %1540 = vst [vmem:[%s3110_s29 + $0x60] sm:$0xff] %v1524_v41  ;;  %v1517_v48 = vadd.f32 %v1468_v46, %v1328_v38  ;;  %v1525_v49 = vadd.f32 %v1500_v47, %v1336_v39 }
 0x4c1   : > { %1535 = vst [vmem:[%s3110_s29 + $0x38] sm:$0xff] %v1519_v44  ;;  %1543 = vst [vmem:[%s3110_s29 + $0x78] sm:$0xff] %v1527_v45 }
 0x4c2   : > { %1533 = vst [vmem:[%s3110_s29 + $0x28] sm:$0xff] %v1517_v48  ;;  %1541 = vst [vmem:[%s3110_s29 + $0x68] sm:$0xff] %v1525_v49 }
 0x4c3 PF: > { %p1544_p12 = scmp.eq.s32.totalorder %s2587_s19, 1  ;;  %s1547_s28 = sadd.s32 1, %s2591_s20 }
 0x4c4   : > { %p1548_p0 = scmp.lt.s32.totalorder %s1547_s28, 2 }
 0x4c5   : > { %p1545_p10 = pnand %p1544_p12, %p974_p13 }
 0x4c7   : > { %p1546_p3 = pneg %p1545_p10 }
 0x4c9   : > { %p1549_p11 = pnand %p1548_p0, %p1546_p3 }
 0x4ca   : > { %v1553_v50 = vld [vmem:[#allocation4] sm:$0xff] (!%p1549_p11)  ;;  %v1554_v51 = vld [vmem:[#allocation4 + $0x8] sm:$0xff] (!%p1549_p11)  ;;  %v1555_v52 = vld [vmem:[#allocation4 + $0x10] sm:$0xff] (!%p1549_p11) }
 0x4cb   : > { %1552 = sbr.rel (%p1549_p11) target bundleno = 1267 (0x4f3), region = 76  ;;  %1585 = vst [vmem:[#allocation5] sm:$0xff] (!%p1549_p11), %v1553_v50  ;;  %1586 = vst [vmem:[#allocation5 + $0x8] sm:$0xff] (!%p1549_p11), %v1554_v51  ;;  %v1556_v53 = vld [vmem:[#allocation4 + $0x18] sm:$0xff] (!%p1549_p11)  ;;  %v1557_v54 = vld [vmem:[#allocation4 + $0x20] sm:$0xff] (!%p1549_p11) }
 0x4cc   : > { %1587 = vst [vmem:[#allocation5 + $0x10] sm:$0xff] (!%p1549_p11), %v1555_v52  ;;  %v1558_v55 = vld [vmem:[#allocation4 + $0x28] sm:$0xff] (!%p1549_p11)  ;;  %1588 = vst [vmem:[#allocation5 + $0x18] sm:$0xff] (!%p1549_p11), %v1556_v53  ;;  %v1559_v56 = vld [vmem:[#allocation4 + $0x30] sm:$0xff] (!%p1549_p11) }
 0x4cd   : > { %1589 = vst [vmem:[#allocation5 + $0x20] sm:$0xff] (!%p1549_p11), %v1557_v54  ;;  %1590 = vst [vmem:[#allocation5 + $0x28] sm:$0xff] (!%p1549_p11), %v1558_v55  ;;  %v1560_v57 = vld [vmem:[#allocation4 + $0x38] sm:$0xff] (!%p1549_p11)  ;;  %v1561_v58 = vld [vmem:[#allocation4 + $0x40] sm:$0xff] (!%p1549_p11) }
 0x4ce   : > { %1591 = vst [vmem:[#allocation5 + $0x30] sm:$0xff] (!%p1549_p11), %v1559_v56  ;;  %1592 = vst [vmem:[#allocation5 + $0x38] sm:$0xff] (!%p1549_p11), %v1560_v57  ;;  %v1562_v59 = vld [vmem:[#allocation4 + $0x48] sm:$0xff] (!%p1549_p11)  ;;  %v1563_v60 = vld [vmem:[#allocation4 + $0x50] sm:$0xff] (!%p1549_p11) }
 0x4cf   : > { %1593 = vst [vmem:[#allocation5 + $0x40] sm:$0xff] (!%p1549_p11), %v1561_v58  ;;  %v1564_v61 = vld [vmem:[#allocation4 + $0x58] sm:$0xff] (!%p1549_p11)  ;;  %1594 = vst [vmem:[#allocation5 + $0x48] sm:$0xff] (!%p1549_p11), %v1562_v59  ;;  %v1565_v62 = vld [vmem:[#allocation4 + $0x60] sm:$0xff] (!%p1549_p11) }
 0x4d0   : > { %1595 = vst [vmem:[#allocation5 + $0x50] sm:$0xff] (!%p1549_p11), %v1563_v60  ;;  %1596 = vst [vmem:[#allocation5 + $0x58] sm:$0xff] (!%p1549_p11), %v1564_v61  ;;  %v1566_v63 = vld [vmem:[#allocation4 + $0x68] sm:$0xff] (!%p1549_p11)  ;;  %v1567_v0 = vld [vmem:[#allocation4 + $0x70] sm:$0xff] (!%p1549_p11) }
 0x4d1   : > { %1597 = vst [vmem:[#allocation5 + $0x60] sm:$0xff] (!%p1549_p11), %v1565_v62  ;;  %1598 = vst [vmem:[#allocation5 + $0x68] sm:$0xff] (!%p1549_p11), %v1566_v63  ;;  %v1568_v1 = vld [vmem:[#allocation4 + $0x78] sm:$0xff] (!%p1549_p11)  ;;  %v1569_v2 = vld [vmem:[#allocation4 + $0x80] sm:$0xff] (!%p1549_p11) }
 0x4d2   : > { %1599 = vst [vmem:[#allocation5 + $0x70] sm:$0xff] %v1567_v0  ;;  %v1570_v3 = vld [vmem:[#allocation4 + $0x88] sm:$0xff]  ;;  %1600 = vst [vmem:[#allocation5 + $0x78] sm:$0xff] %v1568_v1  ;;  %v1571_v4 = vld [vmem:[#allocation4 + $0x90] sm:$0xff] }
 0x4d3   : > { %1601 = vst [vmem:[#allocation5 + $0x80] sm:$0xff] %v1569_v2  ;;  %1602 = vst [vmem:[#allocation5 + $0x88] sm:$0xff] %v1570_v3  ;;  %v1572_v5 = vld [vmem:[#allocation4 + $0x98] sm:$0xff]  ;;  %v1573_v6 = vld [vmem:[#allocation4 + $0xa0] sm:$0xff] }
 0x4d4   : > { %1603 = vst [vmem:[#allocation5 + $0x90] sm:$0xff] %v1571_v4  ;;  %1604 = vst [vmem:[#allocation5 + $0x98] sm:$0xff] %v1572_v5  ;;  %v1574_v7 = vld [vmem:[#allocation4 + $0xa8] sm:$0xff]  ;;  %v1575_v8 = vld [vmem:[#allocation4 + $0xb0] sm:$0xff] }
 0x4d5   : > { %1605 = vst [vmem:[#allocation5 + $0xa0] sm:$0xff] %v1573_v6  ;;  %v1576_v9 = vld [vmem:[#allocation4 + $0xb8] sm:$0xff]  ;;  %1606 = vst [vmem:[#allocation5 + $0xa8] sm:$0xff] %v1574_v7  ;;  %v1577_v10 = vld [vmem:[#allocation4 + $0xc0] sm:$0xff] }
 0x4d6   : > { %1607 = vst [vmem:[#allocation5 + $0xb0] sm:$0xff] %v1575_v8  ;;  %1608 = vst [vmem:[#allocation5 + $0xb8] sm:$0xff] %v1576_v9  ;;  %v1578_v11 = vld [vmem:[#allocation4 + $0xc8] sm:$0xff]  ;;  %v1579_v12 = vld [vmem:[#allocation4 + $0xd0] sm:$0xff] }
 0x4d7   : > { %1609 = vst [vmem:[#allocation5 + $0xc0] sm:$0xff] %v1577_v10  ;;  %1610 = vst [vmem:[#allocation5 + $0xc8] sm:$0xff] %v1578_v11  ;;  %v1580_v13 = vld [vmem:[#allocation4 + $0xd8] sm:$0xff]  ;;  %v1581_v14 = vld [vmem:[#allocation4 + $0xe0] sm:$0xff] }
 0x4d8   : > { %1611 = vst [vmem:[#allocation5 + $0xd0] sm:$0xff] %v1579_v12  ;;  %v1582_v15 = vld [vmem:[#allocation4 + $0xe8] sm:$0xff]  ;;  %1612 = vst [vmem:[#allocation5 + $0xd8] sm:$0xff] %v1580_v13  ;;  %v1583_v16 = vld [vmem:[#allocation4 + $0xf0] sm:$0xff] }
 0x4d9   : > { %1613 = vst [vmem:[#allocation5 + $0xe0] sm:$0xff] %v1581_v14  ;;  %1614 = vst [vmem:[#allocation5 + $0xe8] sm:$0xff] %v1582_v15  ;;  %v1584_v17 = vld [vmem:[#allocation4 + $0xf8] sm:$0xff]  ;;  %v1617_v18 = vld [vmem:[#allocation6] sm:$0xff] }
 0x4da   : > { %1615 = vst [vmem:[#allocation5 + $0xf0] sm:$0xff] %v1583_v16  ;;  %1616 = vst [vmem:[#allocation5 + $0xf8] sm:$0xff] %v1584_v17  ;;  %v1618_v19 = vld [vmem:[#allocation6 + $0x8] sm:$0xff]  ;;  %v1619_v20 = vld [vmem:[#allocation6 + $0x10] sm:$0xff] }
 0x4db   : > { %1649 = vst [vmem:[#allocation4] sm:$0xff] %v1617_v18  ;;  %v1620_v21 = vld [vmem:[#allocation6 + $0x18] sm:$0xff]  ;;  %1650 = vst [vmem:[#allocation4 + $0x8] sm:$0xff] %v1618_v19  ;;  %v1621_v22 = vld [vmem:[#allocation6 + $0x20] sm:$0xff]  ;;  %v1681_v25 = vpack.c.bf16 %v1618_v19, %v1617_v18 }
 0x4dc   : > { %1651 = vst [vmem:[#allocation4 + $0x10] sm:$0xff] %v1619_v20  ;;  %1652 = vst [vmem:[#allocation4 + $0x18] sm:$0xff] %v1620_v21  ;;  %v1622_v23 = vld [vmem:[#allocation6 + $0x28] sm:$0xff]  ;;  %v1623_v24 = vld [vmem:[#allocation6 + $0x30] sm:$0xff]  ;;  %v1682_v26 = vpack.c.bf16 %v1620_v21, %v1619_v20 }
 0x4dd   : > { %1653 = vst [vmem:[#allocation4 + $0x20] sm:$0xff] %v1621_v22  ;;  %1654 = vst [vmem:[#allocation4 + $0x28] sm:$0xff] %v1622_v23  ;;  %v1624_v27 = vld [vmem:[#allocation6 + $0x38] sm:$0xff]  ;;  %v1625_v28 = vld [vmem:[#allocation6 + $0x40] sm:$0xff]  ;;  %v1683_v30 = vpack.c.bf16 %v1622_v23, %v1621_v22 }
 0x4de   : > { %1655 = vst [vmem:[#allocation4 + $0x30] sm:$0xff] %v1623_v24  ;;  %v1626_v29 = vld [vmem:[#allocation6 + $0x48] sm:$0xff]  ;;  %1656 = vst [vmem:[#allocation4 + $0x38] sm:$0xff] %v1624_v27  ;;  %v1627_v31 = vld [vmem:[#allocation6 + $0x50] sm:$0xff]  ;;  %v1684_v34 = vpack.c.bf16 %v1624_v27, %v1623_v24 }
 0x4df   : > { %1657 = vst [vmem:[#allocation4 + $0x40] sm:$0xff] %v1625_v28  ;;  %1658 = vst [vmem:[#allocation4 + $0x48] sm:$0xff] %v1626_v29  ;;  %v1628_v32 = vld [vmem:[#allocation6 + $0x58] sm:$0xff]  ;;  %v1629_v33 = vld [vmem:[#allocation6 + $0x60] sm:$0xff]  ;;  %v1685_v35 = vpack.c.bf16 %v1626_v29, %v1625_v28 }
 0x4e0   : > { %1697 = vst [vmem:[#allocation3] sm:$0xff] %v1681_v25  ;;  %1698 = vst [vmem:[#allocation3 + $0x8] sm:$0xff] %v1682_v26  ;;  %v1630_v36 = vld [vmem:[#allocation6 + $0x68] sm:$0xff]  ;;  %v1631_v37 = vld [vmem:[#allocation6 + $0x70] sm:$0xff]  ;;  %v1686_v39 = vpack.c.bf16 %v1628_v32, %v1627_v31 }
 0x4e1   : > { %1659 = vst [vmem:[#allocation4 + $0x50] sm:$0xff] %v1627_v31  ;;  %1660 = vst [vmem:[#allocation4 + $0x58] sm:$0xff] %v1628_v32  ;;  %v1632_v38 = vld [vmem:[#allocation6 + $0x78] sm:$0xff]  ;;  %v1633_v40 = vld [vmem:[#allocation6 + $0x80] sm:$0xff]  ;;  %v1687_v43 = vpack.c.bf16 %v1630_v36, %v1629_v33 }
 0x4e2   : > { %1661 = vst [vmem:[#allocation4 + $0x60] sm:$0xff] %v1629_v33  ;;  %1699 = vst [vmem:[#allocation3 + $0x10] sm:$0xff] %v1683_v30  ;;  %v1634_v41 = vld [vmem:[#allocation6 + $0x88] sm:$0xff]  ;;  %v1635_v42 = vld [vmem:[#allocation6 + $0x90] sm:$0xff]  ;;  %v1688_v44 = vpack.c.bf16 %v1632_v38, %v1631_v37 }
 0x4e3   : > { %1662 = vst [vmem:[#allocation4 + $0x68] sm:$0xff] %v1630_v36  ;;  %1663 = vst [vmem:[#allocation4 + $0x70] sm:$0xff] %v1631_v37  ;;  %v1636_v45 = vld [vmem:[#allocation6 + $0x98] sm:$0xff]  ;;  %v1637_v46 = vld [vmem:[#allocation6 + $0xa0] sm:$0xff]  ;;  %v1689_v48 = vpack.c.bf16 %v1634_v41, %v1633_v40 }
 0x4e4   : > { %1664 = vst [vmem:[#allocation4 + $0x78] sm:$0xff] %v1632_v38  ;;  %1700 = vst [vmem:[#allocation3 + $0x18] sm:$0xff] %v1684_v34  ;;  %v1638_v47 = vld [vmem:[#allocation6 + $0xa8] sm:$0xff]  ;;  %v1639_v49 = vld [vmem:[#allocation6 + $0xb0] sm:$0xff]  ;;  %v1690_v52 = vpack.c.bf16 %v1636_v45, %v1635_v42 }
 0x4e5   : > { %1701 = vst [vmem:[#allocation3 + $0x20] sm:$0xff] %v1685_v35  ;;  %1665 = vst [vmem:[#allocation4 + $0x80] sm:$0xff] %v1633_v40  ;;  %v1640_v50 = vld [vmem:[#allocation6 + $0xb8] sm:$0xff]  ;;  %v1641_v51 = vld [vmem:[#allocation6 + $0xc0] sm:$0xff]  ;;  %v1691_v53 = vpack.c.bf16 %v1638_v47, %v1637_v46 }
 0x4e6   : > { %1666 = vst [vmem:[#allocation4 + $0x88] sm:$0xff] %v1634_v41  ;;  %1667 = vst [vmem:[#allocation4 + $0x90] sm:$0xff] %v1635_v42  ;;  %v1642_v54 = vld [vmem:[#allocation6 + $0xc8] sm:$0xff]  ;;  %v1643_v55 = vld [vmem:[#allocation6 + $0xd0] sm:$0xff]  ;;  %v1692_v57 = vpack.c.bf16 %v1640_v50, %v1639_v49 }
 0x4e7   : > { %1702 = vst [vmem:[#allocation3 + $0x28] sm:$0xff] %v1686_v39  ;;  %1668 = vst [vmem:[#allocation4 + $0x98] sm:$0xff] %v1636_v45  ;;  %v1644_v56 = vld [vmem:[#allocation6 + $0xd8] sm:$0xff]  ;;  %v1645_v58 = vld [vmem:[#allocation6 + $0xe0] sm:$0xff]  ;;  %v1693_v61 = vpack.c.bf16 %v1642_v54, %v1641_v51 }
 0x4e8   : > { %1669 = vst [vmem:[#allocation4 + $0xa0] sm:$0xff] %v1637_v46  ;;  %1670 = vst [vmem:[#allocation4 + $0xa8] sm:$0xff] %v1638_v47  ;;  %v1646_v59 = vld [vmem:[#allocation6 + $0xe8] sm:$0xff]  ;;  %v1647_v60 = vld [vmem:[#allocation6 + $0xf0] sm:$0xff]  ;;  %v1694_v62 = vpack.c.bf16 %v1644_v56, %v1643_v55 }
 0x4e9   : > { %1703 = vst [vmem:[#allocation3 + $0x30] sm:$0xff] %v1687_v43  ;;  %1704 = vst [vmem:[#allocation3 + $0x38] sm:$0xff] %v1688_v44  ;;  %v1648_v63 = vld [vmem:[#allocation6 + $0xf8] sm:$0xff]  ;;  %v1695_v0 = vpack.c.bf16 %v1646_v59, %v1645_v58 }
 0x4ea   : > { %1671 = vst [vmem:[#allocation4 + $0xb0] sm:$0xff] %v1639_v49  ;;  %1672 = vst [vmem:[#allocation4 + $0xb8] sm:$0xff] %v1640_v50  ;;  %v1696_v1 = vpack.c.bf16 %v1648_v63, %v1647_v60 }
 0x4eb   : > { %1673 = vst [vmem:[#allocation4 + $0xc0] sm:$0xff] %v1641_v51  ;;  %1705 = vst [vmem:[#allocation3 + $0x40] sm:$0xff] %v1689_v48 }
 0x4ec   : > { %1674 = vst [vmem:[#allocation4 + $0xc8] sm:$0xff] %v1642_v54  ;;  %1675 = vst [vmem:[#allocation4 + $0xd0] sm:$0xff] %v1643_v55 }
 0x4ed   : > { %1676 = vst [vmem:[#allocation4 + $0xd8] sm:$0xff] %v1644_v56  ;;  %1706 = vst [vmem:[#allocation3 + $0x48] sm:$0xff] %v1690_v52 }
 0x4ee   : > { %1707 = vst [vmem:[#allocation3 + $0x50] sm:$0xff] %v1691_v53  ;;  %1677 = vst [vmem:[#allocation4 + $0xe0] sm:$0xff] %v1645_v58 }
 0x4ef   : > { %1678 = vst [vmem:[#allocation4 + $0xe8] sm:$0xff] %v1646_v59  ;;  %1679 = vst [vmem:[#allocation4 + $0xf0] sm:$0xff] %v1647_v60 }
 0x4f0   : > { %1708 = vst [vmem:[#allocation3 + $0x58] sm:$0xff] %v1692_v57  ;;  %1680 = vst [vmem:[#allocation4 + $0xf8] sm:$0xff] %v1648_v63 }
 0x4f1   : > { %1709 = vst [vmem:[#allocation3 + $0x60] sm:$0xff] %v1693_v61  ;;  %1710 = vst [vmem:[#allocation3 + $0x68] sm:$0xff] %v1694_v62 }
 0x4f2   : > { %1711 = vst [vmem:[#allocation3 + $0x70] sm:$0xff] %v1695_v0  ;;  %1712 = vst [vmem:[#allocation3 + $0x78] sm:$0xff] %v1696_v1 }
 0x4f3 PF: > { %p2238_p6 = scmp.eq.s32.totalorder %s2693_s25, 7  ;;  %s2616_s18 = smov [#allocation13]  }
 0x4f4   : > { %s1719_s19 = sshll.u32 %s2616_s18, 4  ;;  %s1720_s19 = int_to_ptr.vmem [resolvable:$true] %s1719_s19 }
 0x4f5   : > { %s2487_s20 = scalar_lea.vmem %s1720_s19, 4096  ;;  %p2494_p5 = scmp.lt.s32.totalorder %s1720_s19, %s1720_s19 }
 0x4f6   : > { %p2488_p8 = scmp.ne.s32.totalorder %s1720_s19, %s2487_s20  ;;  %p2495_p13 = scmp.lt.s32.totalorder %s2487_s20, %s2487_s20 }
 0x4f8   : > { %p2489_p1 = pnand %p2488_p8, %p2238_p6  ;;  %p2496_p2 = por %p2495_p13, %p2494_p5 }
 0x4fa   : > { %p2490_p4 = pneg %p2489_p1 }
 0x4fc   : > { %p2497_p7 = pnand %p2496_p2, %p2490_p4 }
 0x4fe   : > { %2500 = shalt.err (!%p2497_p7)
}
 0x4ff   : > { %s3232_s15 = sld [smem:[#allocation20_spill]] }
 0x505   : > { %s3233_s30 = smov %s3232_s15  ;;  %s2501_s6 = scalar_lea.hbm %s3232_s15, 4096 }
 0x506   : > { %p2502_p9 = scmp.ne.s32.totalorder %s3233_s30, %s2501_s6  ;;  %p2507_p0 = scmp.lt.u32.totalorder %s2501_s6, %s3233_s30 }
 0x508   : > { %p2503_p12 = pnand %p2502_p9, %p2238_p6 }
 0x50a   : > { %p2504_p10 = pneg %p2503_p12 }
 0x50c   : > { %p2509_p3 = pnand %p2507_p0, %p2504_p10 }
 0x50e   : > { %2512 = shalt.err (!%p2509_p3)
}
 0x50f   : > { %s2617_s27 = smov 128   ;;  %s2618_s10 = smov 8  }
 0x510   : > { %2219 = dma.vmem_to_hbm [thread:$0]  (%p2238_p6), %s1720_s19, 4096, %s3233_s30, [#allocation9], %s2617_s27, %s2617_s27, %s2618_s10  }
 0x511   : > { %2566 = dma.done.wait (%p2238_p6), [#allocation9], 4096  }
 0x512   : > { %2568 = vsyncadd (%p2238_p6), [#allocation9], 4294963200 }
 0x513 PF: > { %s19_s24 = sadd.s32 1, %s2607_s24   ;;  %s3234_s15 = smov %s2575_s16 }
 0x514   : > { %p16_p11 = scmp.ge.s32.totalorder %s19_s24, 10   ;;  %s3235_s16 = smov %s2579_s17 }
 0x515   : > { %s3236_s17 = smov %s2796_s9  ;;  %s3237_s18 = smov %s2595_s21 }
 0x516   : > { %s3238_s19 = smov %s2599_s22  ;;  %s3239_s20 = smov %s2603_s23 }
 0x517   : > { %s3240_s21 = smov %s3244_s7  ;;  %s3241_s22 = smov %s3248_s26 }
 0x518   : > { %s3242_s23 = smov %s3252_s5  ;;  %18 = sbr.rel (!%p16_p11) target bundleno = 12 (0xc), region = 120 }
 0x51f   :  { %1735 = vsyncpa [#allocation8], 1 }
 0x520   :  { %1737 = vsyncpa [#allocation8 + $0x1], 1 }
 0x521   :  { %1738 = vsyncpa [#allocation11], 1 }
 0x522   :  { %1740 = vsyncpa [#allocation11 + $0x1], 1 }
 0x523   :  { %1741 = vsyncpa [#allocation9], 1 }
 0x524   :  { %1743 = vsyncpa [#allocation9 + $0x1], 1 }

</bundles_post_ra>
